<compile_context>
chip_gen: v5e
topology: v5e:2x2
jax: 0.10.0
libtpu: 0.0.40
codegen_flags: <defaults>
</compile_context>

<pallas_src>
import jax
import jax.numpy as jnp
from jax import lax
from jax.experimental import pallas as pl
from jax.experimental.pallas import tpu as pltpu


def lstm_disc_kernel(x_ref, w_ih_ref, w_hh_ref, b_ref, w_out_ref, b_out_ref,
                     out_ref):
    """One-shot kernel: whole sequence resident on-chip, sequential recurrence.

    x_ref     : (T,)   SMEM   input sequence (scalar per step)
    w_ih_ref  : (1, 4*Hp)     input->gates weights (transposed, [i|f|g|o],
                              padded, g rows pre-scaled by 2)
    w_hh_ref  : (Hp, 4*Hp)    hidden->gates weights (transposed, padded,
                              g columns pre-scaled by 2)
    b_ref     : (1, 4*Hp)     combined bias b_ih + b_hh (padded, g pre-scaled)
    w_out_ref : (1, Hp)       final linear weight row (padded)
    b_out_ref : (1,)   SMEM   final linear bias (scalar)
    out_ref   : (T, 1)        sigmoid(linear(h_t)) per timestep
    """
    Hp = w_hh_ref.shape[0]
    T = out_ref.shape[0]

    # Hoisted loop invariants (small: 4 + 4 vregs).
    w_ih = w_ih_ref[...]                                     # (1, 4*Hp)
    bias = b_ref[...]                                        # (1, 4*Hp)
    row_ids = lax.broadcasted_iota(jnp.int32, (T, Hp), 0)    # hoisted once

    def step(t, carry):
        h, c, hs = carry
        x_t = x_ref[t]                                       # f32 scalar (SMEM)
        # Input part: scalar broadcast on the VPU; hidden part: (1,Hp)@(Hp,4Hp)
        # on the MXU. The two are independent and overlap.
        gates = x_t * w_ih + bias + jnp.dot(
            h, w_hh_ref[...], preferred_element_type=jnp.float32)

        # One sigmoid over all four gates; g recovered via tanh(x)=2*sig(2x)-1
        # (the 2x pre-scaling was folded into the weights at prep time).
        sig = jax.nn.sigmoid(gates)                          # (1, 4*Hp)
        i_g = sig[:, 0:Hp]
        f_g = sig[:, Hp:2 * Hp]
        g_g = 2.0 * sig[:, 2 * Hp:3 * Hp] - 1.0
        o_g = sig[:, 3 * Hp:4 * Hp]

        c_new = f_g * c + i_g * g_g
        h_new = o_g * jnp.tanh(c_new)
        # Register-resident history update: 1 compare + 1 select on one vreg.
        hs_new = jnp.where(row_ids == t, h_new, hs)
        return (h_new, c_new, hs_new)

    h0 = jnp.zeros((1, Hp), jnp.float32)
    c0 = jnp.zeros((1, Hp), jnp.float32)
    hs0 = jnp.zeros((T, Hp), jnp.float32)
    _, _, hs = lax.fori_loop(0, T, step, (h0, c0, hs0), unroll=True)

    # Hoisted Linear + Sigmoid over all timesteps. N=1 projection done as a
    # VPU broadcast multiply + XLU lane reduction (MXU would waste 255/256
    # output columns). Padded lanes of w_out/hs are zero, so the sum is exact.
    logits = jnp.sum(hs * w_out_ref[...], axis=-1, keepdims=True) + b_out_ref[0]
    out_ref[...] = jax.nn.sigmoid(logits)


def _pad_gate_blocks(w, H, H_pad):
    """Zero-pad the leading 4H gate axis [i|f|g|o] of `w` to 4*H_pad."""
    if H_pad == H:
        return w
    blocks = jnp.split(w, 4, axis=0)
    pad = [(0, H_pad - H)] + [(0, 0)] * (w.ndim - 1)
    return jnp.concatenate([jnp.pad(blk, pad) for blk in blocks], axis=0)


def _prescale_g(w, H):
    """Scale the g-gate rows (index block 2 of [i|f|g|o]) by 2 so the kernel
    can use tanh(x) == 2*sigmoid(2x) - 1 with a single fused sigmoid."""
    scale = jnp.concatenate([jnp.ones((2 * H,), jnp.float32),
                             jnp.full((H,), 2.0, jnp.float32),
                             jnp.ones((H,), jnp.float32)])
    return w * scale.reshape((-1,) + (1,) * (w.ndim - 1))


def prepare_params(params, hidden_dim):
    """One-time (init-time) parameter preprocessing: pad each gate block to a
    multiple of 128 lanes, fuse the two biases, pre-scale the g gate by 2, and
    lay weights out transposed for the kernel. Kept OUT of the per-call path."""
    H = hidden_dim
    H_pad = ((H + 127) // 128) * 128

    w_ih = _prescale_g(params["w_ih"].astype(jnp.float32), H)        # (4H, 1)
    w_hh = _prescale_g(params["w_hh"].astype(jnp.float32), H)        # (4H, H)
    b = _prescale_g((params["b_ih"] + params["b_hh"]).astype(jnp.float32), H)

    w_ih_t = _pad_gate_blocks(w_ih, H, H_pad).T                      # (1, 4*Hp)
    w_hh_p = _pad_gate_blocks(w_hh, H, H_pad)                        # (4*Hp, H)
    w_hh_p = jnp.pad(w_hh_p, ((0, 0), (0, H_pad - H)))               # (4*Hp, Hp)
    w_hh_t = w_hh_p.T                                                # (Hp, 4*Hp)
    b_row = _pad_gate_blocks(b, H, H_pad).reshape(1, 4 * H_pad)      # (1, 4*Hp)
    w_out_row = jnp.pad(params["w_out"].astype(jnp.float32),
                        ((0, 0), (0, H_pad - H)))                    # (1, Hp)
    b_out = params["b_out"].reshape(1).astype(jnp.float32)           # (1,)

    return {"w_ih_t": w_ih_t, "w_hh_t": w_hh_t, "b": b_row,
            "w_out_row": w_out_row, "b_out": b_out}


def lstm_discriminator_forward(x, prepped):
    """x: (batch=1, seq_len) float32, prepped: output of prepare_params.
    Returns (batch, seq_len, 1)."""
    batch_size, seq_len = x.shape
    assert batch_size == 1, "forward's .view(seq_len, 1) requires batch_size == 1"
    assert prepped["w_ih_t"].shape[0] == 1, "in_dim must be 1"

    x_seq = x.reshape(seq_len).astype(jnp.float32)                   # (T,) SMEM

    vmem = pl.BlockSpec(memory_space=pltpu.MemorySpace.VMEM)
    smem = pl.BlockSpec(memory_space=pltpu.MemorySpace.SMEM)

    out = pl.pallas_call(
        lstm_disc_kernel,
        out_shape=jax.ShapeDtypeStruct((seq_len, 1), jnp.float32),
        in_specs=[smem, vmem, vmem, vmem, vmem, smem],
        out_specs=vmem,
    )(x_seq, prepped["w_ih_t"], prepped["w_hh_t"], prepped["b"],
      prepped["w_out_row"], prepped["b_out"])

    return out.reshape(batch_size, seq_len, 1)


def lstm_discriminator_ref(x, params, hidden_dim):
    """Pure-JAX reference mirroring the PyTorch forward, for validation."""
    batch_size, seq_len = x.shape
    H = hidden_dim
    x_seq = x.reshape(seq_len, 1).astype(jnp.float32)
    w_ih, w_hh = params["w_ih"], params["w_hh"]
    b = params["b_ih"] + params["b_hh"]

    def step(carry, x_t):
        h, c = carry
        gates = x_t @ w_ih.T + h @ w_hh.T + b
        i = jax.nn.sigmoid(gates[0:H])
        f = jax.nn.sigmoid(gates[H:2 * H])
        g = jnp.tanh(gates[2 * H:3 * H])
        o = jax.nn.sigmoid(gates[3 * H:4 * H])
        c = f * c + i * g
        h = o * jnp.tanh(c)
        return (h, c), h

    init = (jnp.zeros((H,), jnp.float32), jnp.zeros((H,), jnp.float32))
    _, hs = lax.scan(step, init, x_seq)                              # (T, H)
    out = jax.nn.sigmoid(hs @ params["w_out"].T + params["b_out"])   # (T, 1)
    return out.reshape(batch_size, seq_len, 1)


def init_params(key, in_dim, hidden_dim):
    H = hidden_dim
    ks = jax.random.split(key, 6)
    s = 1.0 / jnp.sqrt(H)
    return {
        "w_ih": jax.random.uniform(ks[0], (4 * H, in_dim), jnp.float32, -s, s),
        "w_hh": jax.random.uniform(ks[1], (4 * H, H), jnp.float32, -s, s),
        "b_ih": jax.random.uniform(ks[2], (4 * H,), jnp.float32, -s, s),
        "b_hh": jax.random.uniform(ks[3], (4 * H,), jnp.float32, -s, s),
        "w_out": jax.random.uniform(ks[4], (1, H), jnp.float32, -s, s),
        "b_out": jax.random.uniform(ks[5], (1,), jnp.float32, -s, s),
    }


if __name__ == "__main__":
    # forward()'s view(seq_len, 1) forces batch=1 and in_dim=1.
    BATCH, SEQ_LEN, IN_DIM, HIDDEN = 1, 8, 1, 32

    key = jax.random.PRNGKey(0)
    k_x, k_p = jax.random.split(key)
    x = jax.random.normal(k_x, (BATCH, SEQ_LEN), jnp.float32)
    params = init_params(k_p, IN_DIM, HIDDEN)

    # One-time parameter preprocessing (hoisted out of the per-call path).
    prepped = jax.tree_util.tree_map(jax.block_until_ready,
                                     prepare_params(params, HIDDEN))

    fwd = jax.jit(lstm_discriminator_forward)
    out = fwd(x, prepped)
    out = jax.block_until_ready(out)

    ref = lstm_discriminator_ref(x, params, HIDDEN)
    assert out.shape == (BATCH, SEQ_LEN, 1)
    assert jnp.allclose(out, ref, atol=1e-5, rtol=1e-5)

    print("KERNEL_OK")
</pallas_src>

<mosaic_0001>
module attributes {stable_mosaic.version = 11 : i64} {
  func.func @lstm_disc_kernel(%arg0: memref<8xf32, #tpu.memory_space<smem>>, %arg1: memref<1x512xf32, #tpu.memory_space<vmem>>, %arg2: memref<128x512xf32, #tpu.memory_space<vmem>>, %arg3: memref<1x512xf32, #tpu.memory_space<vmem>>, %arg4: memref<1x128xf32, #tpu.memory_space<vmem>>, %arg5: memref<1xf32, #tpu.memory_space<smem>>, %arg6: memref<8x1xf32, #tpu.memory_space<vmem>>) attributes {dimension_semantics = [], scalar_prefetch = 0 : i64, scratch_operands = 0 : i64, tpu.core_type = #tpu.core_type<tc>} {
    %c0 = arith.constant 0 : index
    %c0_0 = arith.constant 0 : index
    %0 = vector.load %arg1[%c0, %c0_0] : memref<1x512xf32, #tpu.memory_space<vmem>>, vector<1x512xf32>
    %c0_1 = arith.constant 0 : index
    %c0_2 = arith.constant 0 : index
    %1 = vector.load %arg3[%c0_1, %c0_2] : memref<1x512xf32, #tpu.memory_space<vmem>>, vector<1x512xf32>
    %2 = tpu.iota {dimensions = array<i32: 0>} : vector<8x128xi32>
    %cst = arith.constant 0.000000e+00 : f32
    %3 = vector.broadcast %cst : f32 to vector<1x128xf32>
    %cst_3 = arith.constant 0.000000e+00 : f32
    %4 = vector.broadcast %cst_3 : f32 to vector<1x128xf32>
    %cst_4 = arith.constant 0.000000e+00 : f32
    %5 = vector.broadcast %cst_4 : f32 to vector<8x128xf32>
    %c0_i32 = arith.constant 0 : i32
    %6 = arith.index_cast %c0_i32 : i32 to index
    %7 = memref.load %arg0[%6] : memref<8xf32, #tpu.memory_space<smem>>
    %8 = vector.broadcast %7 : f32 to vector<1x512xf32>
    %9 = arith.mulf %8, %0 : vector<1x512xf32>
    %10 = arith.addf %9, %1 : vector<1x512xf32>
    %c0_5 = arith.constant 0 : index
    %c0_6 = arith.constant 0 : index
    %11 = vector.load %arg2[%c0_5, %c0_6] : memref<128x512xf32, #tpu.memory_space<vmem>>, vector<128x512xf32>
    %cst_7 = arith.constant dense<0.000000e+00> : vector<1x512xf32>
    %12 = tpu.matmul %3, %11, %cst_7 {dimension_numbers = #tpu.dot_dimension_numbers<[1], [0], [0], [1], [0, 0, 1, 1], [], []>} : vector<1x128xf32>, vector<128x512xf32>, vector<1x512xf32> -> vector<1x512xf32>
    %13 = arith.addf %10, %12 : vector<1x512xf32>
    %14 = arith.negf %13 : vector<1x512xf32>
    %15 = math.exp %14 : vector<1x512xf32>
    %cst_8 = arith.constant 1.000000e+00 : f32
    %16 = vector.broadcast %cst_8 : f32 to vector<1x512xf32>
    %17 = arith.addf %16, %15 : vector<1x512xf32>
    %18 = arith.divf %16, %17 : vector<1x512xf32>
    %19 = vector.extract_strided_slice %18 {offsets = [0, 0], sizes = [1, 128], strides = [1, 1]} : vector<1x512xf32> to vector<1x128xf32>
    %20 = vector.extract_strided_slice %18 {offsets = [0, 128], sizes = [1, 128], strides = [1, 1]} : vector<1x512xf32> to vector<1x128xf32>
    %21 = vector.extract_strided_slice %18 {offsets = [0, 256], sizes = [1, 128], strides = [1, 1]} : vector<1x512xf32> to vector<1x128xf32>
    %cst_9 = arith.constant 2.000000e+00 : f32
    %22 = vector.broadcast %cst_9 : f32 to vector<1x128xf32>
    %23 = arith.mulf %22, %21 : vector<1x128xf32>
    %cst_10 = arith.constant 1.000000e+00 : f32
    %24 = vector.broadcast %cst_10 : f32 to vector<1x128xf32>
    %25 = arith.subf %23, %24 : vector<1x128xf32>
    %26 = vector.extract_strided_slice %18 {offsets = [0, 384], sizes = [1, 128], strides = [1, 1]} : vector<1x512xf32> to vector<1x128xf32>
    %27 = arith.mulf %20, %4 : vector<1x128xf32>
    %28 = arith.mulf %19, %25 : vector<1x128xf32>
    %29 = arith.addf %27, %28 : vector<1x128xf32>
    %30 = math.tanh %29 : vector<1x128xf32>
    %31 = arith.mulf %26, %30 : vector<1x128xf32>
    %32 = vector.broadcast %c0_i32 : i32 to vector<8x128xi32>
    %33 = arith.cmpi eq, %2, %32 : vector<8x128xi32>
    %34 = vector.shape_cast %31 : vector<1x128xf32> to vector<1x128xf32>
    %35 = vector.broadcast %34 : vector<1x128xf32> to vector<8x128xf32>
    %36 = arith.select %33, %35, %5 : vector<8x128xi1>, vector<8x128xf32>
    %c1_i32 = arith.constant 1 : i32
    %37 = arith.index_cast %c1_i32 : i32 to index
    %38 = memref.load %arg0[%37] : memref<8xf32, #tpu.memory_space<smem>>
    %39 = vector.broadcast %38 : f32 to vector<1x512xf32>
    %40 = arith.mulf %39, %0 : vector<1x512xf32>
    %41 = arith.addf %40, %1 : vector<1x512xf32>
    %c0_11 = arith.constant 0 : index
    %c0_12 = arith.constant 0 : index
    %42 = vector.load %arg2[%c0_11, %c0_12] : memref<128x512xf32, #tpu.memory_space<vmem>>, vector<128x512xf32>
    %cst_13 = arith.constant dense<0.000000e+00> : vector<1x512xf32>
    %43 = tpu.matmul %31, %42, %cst_13 {dimension_numbers = #tpu.dot_dimension_numbers<[1], [0], [0], [1], [0, 0, 1, 1], [], []>} : vector<1x128xf32>, vector<128x512xf32>, vector<1x512xf32> -> vector<1x512xf32>
    %44 = arith.addf %41, %43 : vector<1x512xf32>
    %45 = arith.negf %44 : vector<1x512xf32>
    %46 = math.exp %45 : vector<1x512xf32>
    %cst_14 = arith.constant 1.000000e+00 : f32
    %47 = vector.broadcast %cst_14 : f32 to vector<1x512xf32>
    %48 = arith.addf %47, %46 : vector<1x512xf32>
    %49 = arith.divf %47, %48 : vector<1x512xf32>
    %50 = vector.extract_strided_slice %49 {offsets = [0, 0], sizes = [1, 128], strides = [1, 1]} : vector<1x512xf32> to vector<1x128xf32>
    %51 = vector.extract_strided_slice %49 {offsets = [0, 128], sizes = [1, 128], strides = [1, 1]} : vector<1x512xf32> to vector<1x128xf32>
    %52 = vector.extract_strided_slice %49 {offsets = [0, 256], sizes = [1, 128], strides = [1, 1]} : vector<1x512xf32> to vector<1x128xf32>
    %cst_15 = arith.constant 2.000000e+00 : f32
    %53 = vector.broadcast %cst_15 : f32 to vector<1x128xf32>
    %54 = arith.mulf %53, %52 : vector<1x128xf32>
    %cst_16 = arith.constant 1.000000e+00 : f32
    %55 = vector.broadcast %cst_16 : f32 to vector<1x128xf32>
    %56 = arith.subf %54, %55 : vector<1x128xf32>
    %57 = vector.extract_strided_slice %49 {offsets = [0, 384], sizes = [1, 128], strides = [1, 1]} : vector<1x512xf32> to vector<1x128xf32>
    %58 = arith.mulf %51, %29 : vector<1x128xf32>
    %59 = arith.mulf %50, %56 : vector<1x128xf32>
    %60 = arith.addf %58, %59 : vector<1x128xf32>
    %61 = math.tanh %60 : vector<1x128xf32>
    %62 = arith.mulf %57, %61 : vector<1x128xf32>
    %63 = vector.broadcast %c1_i32 : i32 to vector<8x128xi32>
    %64 = arith.cmpi eq, %2, %63 : vector<8x128xi32>
    %65 = vector.shape_cast %62 : vector<1x128xf32> to vector<1x128xf32>
    %66 = vector.broadcast %65 : vector<1x128xf32> to vector<8x128xf32>
    %67 = arith.select %64, %66, %36 : vector<8x128xi1>, vector<8x128xf32>
    %c2_i32 = arith.constant 2 : i32
    %68 = arith.index_cast %c2_i32 : i32 to index
    %69 = memref.load %arg0[%68] : memref<8xf32, #tpu.memory_space<smem>>
    %70 = vector.broadcast %69 : f32 to vector<1x512xf32>
    %71 = arith.mulf %70, %0 : vector<1x512xf32>
    %72 = arith.addf %71, %1 : vector<1x512xf32>
    %c0_17 = arith.constant 0 : index
    %c0_18 = arith.constant 0 : index
    %73 = vector.load %arg2[%c0_17, %c0_18] : memref<128x512xf32, #tpu.memory_space<vmem>>, vector<128x512xf32>
    %cst_19 = arith.constant dense<0.000000e+00> : vector<1x512xf32>
    %74 = tpu.matmul %62, %73, %cst_19 {dimension_numbers = #tpu.dot_dimension_numbers<[1], [0], [0], [1], [0, 0, 1, 1], [], []>} : vector<1x128xf32>, vector<128x512xf32>, vector<1x512xf32> -> vector<1x512xf32>
    %75 = arith.addf %72, %74 : vector<1x512xf32>
    %76 = arith.negf %75 : vector<1x512xf32>
    %77 = math.exp %76 : vector<1x512xf32>
    %cst_20 = arith.constant 1.000000e+00 : f32
    %78 = vector.broadcast %cst_20 : f32 to vector<1x512xf32>
    %79 = arith.addf %78, %77 : vector<1x512xf32>
    %80 = arith.divf %78, %79 : vector<1x512xf32>
    %81 = vector.extract_strided_slice %80 {offsets = [0, 0], sizes = [1, 128], strides = [1, 1]} : vector<1x512xf32> to vector<1x128xf32>
    %82 = vector.extract_strided_slice %80 {offsets = [0, 128], sizes = [1, 128], strides = [1, 1]} : vector<1x512xf32> to vector<1x128xf32>
    %83 = vector.extract_strided_slice %80 {offsets = [0, 256], sizes = [1, 128], strides = [1, 1]} : vector<1x512xf32> to vector<1x128xf32>
    %cst_21 = arith.constant 2.000000e+00 : f32
    %84 = vector.broadcast %cst_21 : f32 to vector<1x128xf32>
    %85 = arith.mulf %84, %83 : vector<1x128xf32>
    %cst_22 = arith.constant 1.000000e+00 : f32
    %86 = vector.broadcast %cst_22 : f32 to vector<1x128xf32>
    %87 = arith.subf %85, %86 : vector<1x128xf32>
    %88 = vector.extract_strided_slice %80 {offsets = [0, 384], sizes = [1, 128], strides = [1, 1]} : vector<1x512xf32> to vector<1x128xf32>
    %89 = arith.mulf %82, %60 : vector<1x128xf32>
    %90 = arith.mulf %81, %87 : vector<1x128xf32>
    %91 = arith.addf %89, %90 : vector<1x128xf32>
    %92 = math.tanh %91 : vector<1x128xf32>
    %93 = arith.mulf %88, %92 : vector<1x128xf32>
    %94 = vector.broadcast %c2_i32 : i32 to vector<8x128xi32>
    %95 = arith.cmpi eq, %2, %94 : vector<8x128xi32>
    %96 = vector.shape_cast %93 : vector<1x128xf32> to vector<1x128xf32>
    %97 = vector.broadcast %96 : vector<1x128xf32> to vector<8x128xf32>
    %98 = arith.select %95, %97, %67 : vector<8x128xi1>, vector<8x128xf32>
    %c3_i32 = arith.constant 3 : i32
    %99 = arith.index_cast %c3_i32 : i32 to index
    %100 = memref.load %arg0[%99] : memref<8xf32, #tpu.memory_space<smem>>
    %101 = vector.broadcast %100 : f32 to vector<1x512xf32>
    %102 = arith.mulf %101, %0 : vector<1x512xf32>
    %103 = arith.addf %102, %1 : vector<1x512xf32>
    %c0_23 = arith.constant 0 : index
    %c0_24 = arith.constant 0 : index
    %104 = vector.load %arg2[%c0_23, %c0_24] : memref<128x512xf32, #tpu.memory_space<vmem>>, vector<128x512xf32>
    %cst_25 = arith.constant dense<0.000000e+00> : vector<1x512xf32>
    %105 = tpu.matmul %93, %104, %cst_25 {dimension_numbers = #tpu.dot_dimension_numbers<[1], [0], [0], [1], [0, 0, 1, 1], [], []>} : vector<1x128xf32>, vector<128x512xf32>, vector<1x512xf32> -> vector<1x512xf32>
    %106 = arith.addf %103, %105 : vector<1x512xf32>
    %107 = arith.negf %106 : vector<1x512xf32>
    %108 = math.exp %107 : vector<1x512xf32>
    %cst_26 = arith.constant 1.000000e+00 : f32
    %109 = vector.broadcast %cst_26 : f32 to vector<1x512xf32>
    %110 = arith.addf %109, %108 : vector<1x512xf32>
    %111 = arith.divf %109, %110 : vector<1x512xf32>
    %112 = vector.extract_strided_slice %111 {offsets = [0, 0], sizes = [1, 128], strides = [1, 1]} : vector<1x512xf32> to vector<1x128xf32>
    %113 = vector.extract_strided_slice %111 {offsets = [0, 128], sizes = [1, 128], strides = [1, 1]} : vector<1x512xf32> to vector<1x128xf32>
    %114 = vector.extract_strided_slice %111 {offsets = [0, 256], sizes = [1, 128], strides = [1, 1]} : vector<1x512xf32> to vector<1x128xf32>
    %cst_27 = arith.constant 2.000000e+00 : f32
    %115 = vector.broadcast %cst_27 : f32 to vector<1x128xf32>
    %116 = arith.mulf %115, %114 : vector<1x128xf32>
    %cst_28 = arith.constant 1.000000e+00 : f32
    %117 = vector.broadcast %cst_28 : f32 to vector<1x128xf32>
    %118 = arith.subf %116, %117 : vector<1x128xf32>
    %119 = vector.extract_strided_slice %111 {offsets = [0, 384], sizes = [1, 128], strides = [1, 1]} : vector<1x512xf32> to vector<1x128xf32>
    %120 = arith.mulf %113, %91 : vector<1x128xf32>
    %121 = arith.mulf %112, %118 : vector<1x128xf32>
    %122 = arith.addf %120, %121 : vector<1x128xf32>
    %123 = math.tanh %122 : vector<1x128xf32>
    %124 = arith.mulf %119, %123 : vector<1x128xf32>
    %125 = vector.broadcast %c3_i32 : i32 to vector<8x128xi32>
    %126 = arith.cmpi eq, %2, %125 : vector<8x128xi32>
    %127 = vector.shape_cast %124 : vector<1x128xf32> to vector<1x128xf32>
    %128 = vector.broadcast %127 : vector<1x128xf32> to vector<8x128xf32>
    %129 = arith.select %126, %128, %98 : vector<8x128xi1>, vector<8x128xf32>
    %c4_i32 = arith.constant 4 : i32
    %130 = arith.index_cast %c4_i32 : i32 to index
    %131 = memref.load %arg0[%130] : memref<8xf32, #tpu.memory_space<smem>>
    %132 = vector.broadcast %131 : f32 to vector<1x512xf32>
    %133 = arith.mulf %132, %0 : vector<1x512xf32>
    %134 = arith.addf %133, %1 : vector<1x512xf32>
    %c0_29 = arith.constant 0 : index
    %c0_30 = arith.constant 0 : index
    %135 = vector.load %arg2[%c0_29, %c0_30] : memref<128x512xf32, #tpu.memory_space<vmem>>, vector<128x512xf32>
    %cst_31 = arith.constant dense<0.000000e+00> : vector<1x512xf32>
    %136 = tpu.matmul %124, %135, %cst_31 {dimension_numbers = #tpu.dot_dimension_numbers<[1], [0], [0], [1], [0, 0, 1, 1], [], []>} : vector<1x128xf32>, vector<128x512xf32>, vector<1x512xf32> -> vector<1x512xf32>
    %137 = arith.addf %134, %136 : vector<1x512xf32>
    %138 = arith.negf %137 : vector<1x512xf32>
    %139 = math.exp %138 : vector<1x512xf32>
    %cst_32 = arith.constant 1.000000e+00 : f32
    %140 = vector.broadcast %cst_32 : f32 to vector<1x512xf32>
    %141 = arith.addf %140, %139 : vector<1x512xf32>
    %142 = arith.divf %140, %141 : vector<1x512xf32>
    %143 = vector.extract_strided_slice %142 {offsets = [0, 0], sizes = [1, 128], strides = [1, 1]} : vector<1x512xf32> to vector<1x128xf32>
    %144 = vector.extract_strided_slice %142 {offsets = [0, 128], sizes = [1, 128], strides = [1, 1]} : vector<1x512xf32> to vector<1x128xf32>
    %145 = vector.extract_strided_slice %142 {offsets = [0, 256], sizes = [1, 128], strides = [1, 1]} : vector<1x512xf32> to vector<1x128xf32>
    %cst_33 = arith.constant 2.000000e+00 : f32
    %146 = vector.broadcast %cst_33 : f32 to vector<1x128xf32>
    %147 = arith.mulf %146, %145 : vector<1x128xf32>
    %cst_34 = arith.constant 1.000000e+00 : f32
    %148 = vector.broadcast %cst_34 : f32 to vector<1x128xf32>
    %149 = arith.subf %147, %148 : vector<1x128xf32>
    %150 = vector.extract_strided_slice %142 {offsets = [0, 384], sizes = [1, 128], strides = [1, 1]} : vector<1x512xf32> to vector<1x128xf32>
    %151 = arith.mulf %144, %122 : vector<1x128xf32>
    %152 = arith.mulf %143, %149 : vector<1x128xf32>
    %153 = arith.addf %151, %152 : vector<1x128xf32>
    %154 = math.tanh %153 : vector<1x128xf32>
    %155 = arith.mulf %150, %154 : vector<1x128xf32>
    %156 = vector.broadcast %c4_i32 : i32 to vector<8x128xi32>
    %157 = arith.cmpi eq, %2, %156 : vector<8x128xi32>
    %158 = vector.shape_cast %155 : vector<1x128xf32> to vector<1x128xf32>
    %159 = vector.broadcast %158 : vector<1x128xf32> to vector<8x128xf32>
    %160 = arith.select %157, %159, %129 : vector<8x128xi1>, vector<8x128xf32>
    %c5_i32 = arith.constant 5 : i32
    %161 = arith.index_cast %c5_i32 : i32 to index
    %162 = memref.load %arg0[%161] : memref<8xf32, #tpu.memory_space<smem>>
    %163 = vector.broadcast %162 : f32 to vector<1x512xf32>
    %164 = arith.mulf %163, %0 : vector<1x512xf32>
    %165 = arith.addf %164, %1 : vector<1x512xf32>
    %c0_35 = arith.constant 0 : index
    %c0_36 = arith.constant 0 : index
    %166 = vector.load %arg2[%c0_35, %c0_36] : memref<128x512xf32, #tpu.memory_space<vmem>>, vector<128x512xf32>
    %cst_37 = arith.constant dense<0.000000e+00> : vector<1x512xf32>
    %167 = tpu.matmul %155, %166, %cst_37 {dimension_numbers = #tpu.dot_dimension_numbers<[1], [0], [0], [1], [0, 0, 1, 1], [], []>} : vector<1x128xf32>, vector<128x512xf32>, vector<1x512xf32> -> vector<1x512xf32>
    %168 = arith.addf %165, %167 : vector<1x512xf32>
    %169 = arith.negf %168 : vector<1x512xf32>
    %170 = math.exp %169 : vector<1x512xf32>
    %cst_38 = arith.constant 1.000000e+00 : f32
    %171 = vector.broadcast %cst_38 : f32 to vector<1x512xf32>
    %172 = arith.addf %171, %170 : vector<1x512xf32>
    %173 = arith.divf %171, %172 : vector<1x512xf32>
    %174 = vector.extract_strided_slice %173 {offsets = [0, 0], sizes = [1, 128], strides = [1, 1]} : vector<1x512xf32> to vector<1x128xf32>
    %175 = vector.extract_strided_slice %173 {offsets = [0, 128], sizes = [1, 128], strides = [1, 1]} : vector<1x512xf32> to vector<1x128xf32>
    %176 = vector.extract_strided_slice %173 {offsets = [0, 256], sizes = [1, 128], strides = [1, 1]} : vector<1x512xf32> to vector<1x128xf32>
    %cst_39 = arith.constant 2.000000e+00 : f32
    %177 = vector.broadcast %cst_39 : f32 to vector<1x128xf32>
    %178 = arith.mulf %177, %176 : vector<1x128xf32>
    %cst_40 = arith.constant 1.000000e+00 : f32
    %179 = vector.broadcast %cst_40 : f32 to vector<1x128xf32>
    %180 = arith.subf %178, %179 : vector<1x128xf32>
    %181 = vector.extract_strided_slice %173 {offsets = [0, 384], sizes = [1, 128], strides = [1, 1]} : vector<1x512xf32> to vector<1x128xf32>
    %182 = arith.mulf %175, %153 : vector<1x128xf32>
    %183 = arith.mulf %174, %180 : vector<1x128xf32>
    %184 = arith.addf %182, %183 : vector<1x128xf32>
    %185 = math.tanh %184 : vector<1x128xf32>
    %186 = arith.mulf %181, %185 : vector<1x128xf32>
    %187 = vector.broadcast %c5_i32 : i32 to vector<8x128xi32>
    %188 = arith.cmpi eq, %2, %187 : vector<8x128xi32>
    %189 = vector.shape_cast %186 : vector<1x128xf32> to vector<1x128xf32>
    %190 = vector.broadcast %189 : vector<1x128xf32> to vector<8x128xf32>
    %191 = arith.select %188, %190, %160 : vector<8x128xi1>, vector<8x128xf32>
    %c6_i32 = arith.constant 6 : i32
    %192 = arith.index_cast %c6_i32 : i32 to index
    %193 = memref.load %arg0[%192] : memref<8xf32, #tpu.memory_space<smem>>
    %194 = vector.broadcast %193 : f32 to vector<1x512xf32>
    %195 = arith.mulf %194, %0 : vector<1x512xf32>
    %196 = arith.addf %195, %1 : vector<1x512xf32>
    %c0_41 = arith.constant 0 : index
    %c0_42 = arith.constant 0 : index
    %197 = vector.load %arg2[%c0_41, %c0_42] : memref<128x512xf32, #tpu.memory_space<vmem>>, vector<128x512xf32>
    %cst_43 = arith.constant dense<0.000000e+00> : vector<1x512xf32>
    %198 = tpu.matmul %186, %197, %cst_43 {dimension_numbers = #tpu.dot_dimension_numbers<[1], [0], [0], [1], [0, 0, 1, 1], [], []>} : vector<1x128xf32>, vector<128x512xf32>, vector<1x512xf32> -> vector<1x512xf32>
    %199 = arith.addf %196, %198 : vector<1x512xf32>
    %200 = arith.negf %199 : vector<1x512xf32>
    %201 = math.exp %200 : vector<1x512xf32>
    %cst_44 = arith.constant 1.000000e+00 : f32
    %202 = vector.broadcast %cst_44 : f32 to vector<1x512xf32>
    %203 = arith.addf %202, %201 : vector<1x512xf32>
    %204 = arith.divf %202, %203 : vector<1x512xf32>
    %205 = vector.extract_strided_slice %204 {offsets = [0, 0], sizes = [1, 128], strides = [1, 1]} : vector<1x512xf32> to vector<1x128xf32>
    %206 = vector.extract_strided_slice %204 {offsets = [0, 128], sizes = [1, 128], strides = [1, 1]} : vector<1x512xf32> to vector<1x128xf32>
    %207 = vector.extract_strided_slice %204 {offsets = [0, 256], sizes = [1, 128], strides = [1, 1]} : vector<1x512xf32> to vector<1x128xf32>
    %cst_45 = arith.constant 2.000000e+00 : f32
    %208 = vector.broadcast %cst_45 : f32 to vector<1x128xf32>
    %209 = arith.mulf %208, %207 : vector<1x128xf32>
    %cst_46 = arith.constant 1.000000e+00 : f32
    %210 = vector.broadcast %cst_46 : f32 to vector<1x128xf32>
    %211 = arith.subf %209, %210 : vector<1x128xf32>
    %212 = vector.extract_strided_slice %204 {offsets = [0, 384], sizes = [1, 128], strides = [1, 1]} : vector<1x512xf32> to vector<1x128xf32>
    %213 = arith.mulf %206, %184 : vector<1x128xf32>
    %214 = arith.mulf %205, %211 : vector<1x128xf32>
    %215 = arith.addf %213, %214 : vector<1x128xf32>
    %216 = math.tanh %215 : vector<1x128xf32>
    %217 = arith.mulf %212, %216 : vector<1x128xf32>
    %218 = vector.broadcast %c6_i32 : i32 to vector<8x128xi32>
    %219 = arith.cmpi eq, %2, %218 : vector<8x128xi32>
    %220 = vector.shape_cast %217 : vector<1x128xf32> to vector<1x128xf32>
    %221 = vector.broadcast %220 : vector<1x128xf32> to vector<8x128xf32>
    %222 = arith.select %219, %221, %191 : vector<8x128xi1>, vector<8x128xf32>
    %c7_i32 = arith.constant 7 : i32
    %223 = arith.index_cast %c7_i32 : i32 to index
    %224 = memref.load %arg0[%223] : memref<8xf32, #tpu.memory_space<smem>>
    %225 = vector.broadcast %224 : f32 to vector<1x512xf32>
    %226 = arith.mulf %225, %0 : vector<1x512xf32>
    %227 = arith.addf %226, %1 : vector<1x512xf32>
    %c0_47 = arith.constant 0 : index
    %c0_48 = arith.constant 0 : index
    %228 = vector.load %arg2[%c0_47, %c0_48] : memref<128x512xf32, #tpu.memory_space<vmem>>, vector<128x512xf32>
    %cst_49 = arith.constant dense<0.000000e+00> : vector<1x512xf32>
    %229 = tpu.matmul %217, %228, %cst_49 {dimension_numbers = #tpu.dot_dimension_numbers<[1], [0], [0], [1], [0, 0, 1, 1], [], []>} : vector<1x128xf32>, vector<128x512xf32>, vector<1x512xf32> -> vector<1x512xf32>
    %230 = arith.addf %227, %229 : vector<1x512xf32>
    %231 = arith.negf %230 : vector<1x512xf32>
    %232 = math.exp %231 : vector<1x512xf32>
    %cst_50 = arith.constant 1.000000e+00 : f32
    %233 = vector.broadcast %cst_50 : f32 to vector<1x512xf32>
    %234 = arith.addf %233, %232 : vector<1x512xf32>
    %235 = arith.divf %233, %234 : vector<1x512xf32>
    %236 = vector.extract_strided_slice %235 {offsets = [0, 0], sizes = [1, 128], strides = [1, 1]} : vector<1x512xf32> to vector<1x128xf32>
    %237 = vector.extract_strided_slice %235 {offsets = [0, 128], sizes = [1, 128], strides = [1, 1]} : vector<1x512xf32> to vector<1x128xf32>
    %238 = vector.extract_strided_slice %235 {offsets = [0, 256], sizes = [1, 128], strides = [1, 1]} : vector<1x512xf32> to vector<1x128xf32>
    %cst_51 = arith.constant 2.000000e+00 : f32
    %239 = vector.broadcast %cst_51 : f32 to vector<1x128xf32>
    %240 = arith.mulf %239, %238 : vector<1x128xf32>
    %cst_52 = arith.constant 1.000000e+00 : f32
    %241 = vector.broadcast %cst_52 : f32 to vector<1x128xf32>
    %242 = arith.subf %240, %241 : vector<1x128xf32>
    %243 = vector.extract_strided_slice %235 {offsets = [0, 384], sizes = [1, 128], strides = [1, 1]} : vector<1x512xf32> to vector<1x128xf32>
    %244 = arith.mulf %237, %215 : vector<1x128xf32>
    %245 = arith.mulf %236, %242 : vector<1x128xf32>
    %246 = arith.addf %244, %245 : vector<1x128xf32>
    %247 = math.tanh %246 : vector<1x128xf32>
    %248 = arith.mulf %243, %247 : vector<1x128xf32>
    %249 = vector.broadcast %c7_i32 : i32 to vector<8x128xi32>
    %250 = arith.cmpi eq, %2, %249 : vector<8x128xi32>
    %251 = vector.shape_cast %248 : vector<1x128xf32> to vector<1x128xf32>
    %252 = vector.broadcast %251 : vector<1x128xf32> to vector<8x128xf32>
    %253 = arith.select %250, %252, %222 : vector<8x128xi1>, vector<8x128xf32>
    %c8_i32 = arith.constant 8 : i32
    %c0_53 = arith.constant 0 : index
    %c0_54 = arith.constant 0 : index
    %254 = vector.load %arg4[%c0_53, %c0_54] : memref<1x128xf32, #tpu.memory_space<vmem>>, vector<1x128xf32>
    %255 = vector.broadcast %254 : vector<1x128xf32> to vector<8x128xf32>
    %256 = arith.mulf %253, %255 : vector<8x128xf32>
    %cst_55 = arith.constant dense<0.000000e+00> : vector<8xf32>
    %257 = vector.multi_reduction <add>, %256, %cst_55 [1] : vector<8x128xf32> to vector<8xf32>
    %258 = vector.shape_cast %257 : vector<8xf32> to vector<8x1xf32>
    %c0_56 = arith.constant 0 : index
    %259 = memref.load %arg5[%c0_56] : memref<1xf32, #tpu.memory_space<smem>>
    %260 = vector.broadcast %259 : f32 to vector<8x1xf32>
    %261 = arith.addf %258, %260 : vector<8x1xf32>
    %262 = arith.negf %261 : vector<8x1xf32>
    %263 = math.exp %262 : vector<8x1xf32>
    %cst_57 = arith.constant 1.000000e+00 : f32
    %264 = vector.broadcast %cst_57 : f32 to vector<8x1xf32>
    %265 = arith.addf %264, %263 : vector<8x1xf32>
    %266 = arith.divf %264, %265 : vector<8x1xf32>
    %c0_58 = arith.constant 0 : index
    %c0_59 = arith.constant 0 : index
    %267 = vector.load %arg6[%c0_58, %c0_59] : memref<8x1xf32, #tpu.memory_space<vmem>>, vector<8x1xf32>
    tpu.vector_store %arg6[%c0_58, %c0_59], %266 {strides = array<i32>} : memref<8x1xf32, #tpu.memory_space<vmem>>, vector<8x1xf32>,
    return
  }
}

</mosaic_0001>

<bundles_post_ra>
// kernel: lstm_discriminator_forward.1
= control target key start
LH: loop header
LB: loop body
LE: loop exit
PB: predicated region body
PF: predicated region fallthrough
CT: control target
= control target key end

     0   :  { %12 = vsyncpa [#allocation5], 0  ;;  %s2393_s0 = inlined_call_operand.vmem [shape: f32[8], index: 0, kind: input, shape index: {}]   ;;  %s2394_s1 = inlined_call_operand.vmem [shape: f32[1,512], index: 1, kind: input, shape index: {}]   ;;  %s2395_s2 = inlined_call_operand.hbm [shape: f32[128,512], index: 2, kind: input, shape index: {}]   ;;  %s2396_s3 = inlined_call_operand.hbm [shape: f32[1,512], index: 3, kind: input, shape index: {}]   ;;  %s2397_s4 = inlined_call_operand.vmem [shape: f32[1,128], index: 4, kind: input, shape index: {}]   ;;  %s2398_s5 = inlined_call_operand.<no memory space> [shape: f32[1], index: 5, kind: input, shape index: {}]   ;;  %s2399_s6 = inlined_call_operand.vmem [shape: f32[8,1], index: 6, kind: output, shape index: {}]  }
   0x1   :  { %13 = vsyncpa [#allocation4], 0  ;;  %s20_s23 = sshll.u32 %s2393_s0, 4  ;;  %s21_s23 = int_to_ptr.vmem [resolvable:$true] %s20_s23 }
   0x2   :  { %14 = vsyncpa [#allocation8], 0  ;;  %s30_s26 = sshll.u32 %s2395_s2, 4  ;;  %s1463_s27 = smov [#allocation3]   ;;  %s31_s26 = int_to_ptr.hbm [resolvable:$true] %s30_s26 }
   0x3   :  { %23 = dma.vmem_to_smem %s21_s23, 16, %s1463_s27, [#allocation5]  }
   0x4   :  { %s1464_s28 = smov [#allocation6]   ;;  %s1465_s30 = smov 512  }
   0x5   :  { %s32_s29 = sshll.u32 %s1464_s28, 4  ;;  %s1466_s7 = smov 32   ;;  %s33_s29 = int_to_ptr.vmem [resolvable:$true] %s32_s29 }
   0x6   :  { %38 = dma.hbm_to_vmem [thread:$0]  %s31_s26, 8192, %s33_s29, [#allocation4], %s1465_s30, %s1465_s30, %s1466_s7  }
   0x7   :  { %s44_s10 = sshll.u32 %s2396_s3, 4  ;;  %s1467_s0 = smov [#allocation7]   ;;  %s45_s10 = int_to_ptr.hbm [resolvable:$true] %s44_s10 }
   0x8   :  { %s46_s11 = sshll.u32 %s1467_s0, 4  ;;  %s47_s11 = int_to_ptr.vmem [resolvable:$true] %s46_s11 }
   0x9   :  { %49 = dma.hbm_to_vmem [thread:$0]  %s45_s10, 64, %s47_s11, [#allocation8]  }
   0xa   :  { %1457 = dma.done.wait [#allocation5], 16  }
   0xb   :  { %1458 = vsyncadd [#allocation5], 4294967280 }
   0xc   :  { %1459 = dma.done.wait [#allocation4], 8192  }
   0xd   :  { %1460 = vsyncadd [#allocation4], 4294959104 }
   0xe   :  { %1461 = dma.done.wait [#allocation8], 64  }
   0xf   :  { %1462 = vsyncadd [#allocation8], 4294967232 }
  0x10   :  { %66 = sfence }
  0x11   :  { %v1513_v0 = vld [vmem:[#allocation6 + $0x1f0] sm:$0xff]  ;;  %v1515_v1 = vld [vmem:[#allocation6 + $0x1f8] sm:$0xff]  ;;  %v1527_v6 = vld [vmem:[#allocation6 + $0x1e8] sm:$0xff]  ;;  %v1468_v62 = vmov 0.0   ;;  %s71_s2 = sld [smem:[#allocation3]]  ;;  %vm226_vm0 = vcmask 1040384  }
  0x12   :  { %v1517_v2 = vld [vmem:[#allocation6 + $0x1d0] sm:$0xff]  ;;  %179 = vmatpush.msra.mxu2 %v1513_v0  ;;  %199 = vmatpush.msra.mxu3 %v1515_v1  ;;  %v1521_v3 = vld [vmem:[#allocation6 + $0x1d8] sm:$0xff]  ;;  %v1531_v7 = vld [vmem:[#allocation6 + $0x1e0] sm:$0xff]  ;;  %vm228_vm1 = vcmask 1042434   ;;  %vm230_vm2 = vcmask 1041408   ;;  %s1250_s13 = sld [smem:[#allocation3 + $0x1]] }
  0x13   :  { %v1523_v4 = vld [vmem:[#allocation6 + $0x1b0] sm:$0xff]  ;;  %v1525_v5 = vld [vmem:[#allocation6 + $0x1b8] sm:$0xff]  ;;  %v1533_v8 = vld [vmem:[#allocation6 + $0x1c8] sm:$0xff]  ;;  %159 = vmatpush.msra.mxu1 %v1527_v6  ;;  %139 = vmatpush.msra.mxu0 %v1531_v7  ;;  %s1253_s14 = sld [smem:[#allocation3 + $0x2]] }
  0x14   :  { %180 = vmatpush.msra.mxu2 %v1517_v2  ;;  %200 = vmatpush.msra.mxu3 %v1521_v3  ;;  %v1536_v9 = vld [vmem:[#allocation6 + $0x190] sm:$0xff]  ;;  %v1538_v10 = vld [vmem:[#allocation6 + $0x198] sm:$0xff]  ;;  %v1541_v11 = vld [vmem:[#allocation6 + $0x1c0] sm:$0xff]  ;;  %s1256_s15 = sld [smem:[#allocation3 + $0x3]] }
  0x15   :  { %v1545_v12 = vld [vmem:[#allocation6 + $0x1a8] sm:$0xff]  ;;  %v1547_v13 = vld [vmem:[#allocation6 + $0x1a0] sm:$0xff]  ;;  %160 = vmatpush.msra.mxu1 %v1533_v8  ;;  %v1550_v14 = vld [vmem:[#allocation6 + $0x170] sm:$0xff]  ;;  %140 = vmatpush.msra.mxu0 %v1541_v11  ;;  %s1259_s16 = sld [smem:[#allocation3 + $0x4]] }
  0x16   :  { %181 = vmatpush.msra.mxu2 %v1523_v4  ;;  %201 = vmatpush.msra.mxu3 %v1525_v5  ;;  %v1552_v15 = vld [vmem:[#allocation6 + $0x178] sm:$0xff]  ;;  %v1557_v16 = vld [vmem:[#allocation6 + $0x188] sm:$0xff]  ;;  %v1559_v17 = vld [vmem:[#allocation6 + $0x180] sm:$0xff]  ;;  %s1262_s17 = sld [smem:[#allocation3 + $0x5]] }
  0x17   :  { %161 = vmatpush.msra.mxu1 %v1545_v12  ;;  %v1562_v18 = vld [vmem:[#allocation6 + $0x150] sm:$0xff]  ;;  %v1564_v19 = vld [vmem:[#allocation6 + $0x158] sm:$0xff]  ;;  %141 = vmatpush.msra.mxu0 %v1547_v13  ;;  %v1569_v20 = vld [vmem:[#allocation6 + $0x168] sm:$0xff]  ;;  %s1268_s20 = sld [smem:[#allocation3 + $0x7]] }
  0x18   :  { %182 = vmatpush.msra.mxu2 %v1536_v9  ;;  %202 = vmatpush.msra.mxu3 %v1538_v10  ;;  %v1571_v21 = vld [vmem:[#allocation6 + $0x160] sm:$0xff]  ;;  %v1574_v22 = vld [vmem:[#allocation6 + $0x130] sm:$0xff]  ;;  %v1576_v23 = vld [vmem:[#allocation6 + $0x138] sm:$0xff] }
  0x19   :  { %162 = vmatpush.msra.mxu1 %v1557_v16  ;;  %142 = vmatpush.msra.mxu0 %v1559_v17  ;;  %v1581_v24 = vld [vmem:[#allocation6 + $0x148] sm:$0xff]  ;;  %v1583_v25 = vld [vmem:[#allocation6 + $0x140] sm:$0xff]  ;;  %v1586_v26 = vld [vmem:[#allocation6 + $0x110] sm:$0xff] }
  0x1a   :  { %183 = vmatpush.msra.mxu2 %v1550_v14  ;;  %203 = vmatpush.msra.mxu3 %v1552_v15  ;;  %v1588_v27 = vld [vmem:[#allocation6 + $0x118] sm:$0xff]  ;;  %v1593_v28 = vld [vmem:[#allocation6 + $0x128] sm:$0xff]  ;;  %v1595_v29 = vld [vmem:[#allocation6 + $0x120] sm:$0xff] }
  0x1b   :  { %163 = vmatpush.msra.mxu1 %v1569_v20  ;;  %143 = vmatpush.msra.mxu0 %v1571_v21  ;;  %v1598_v30 = vld [vmem:[#allocation6 + $0xf0] sm:$0xff]  ;;  %v1600_v31 = vld [vmem:[#allocation6 + $0xf8] sm:$0xff]  ;;  %v1605_v32 = vld [vmem:[#allocation6 + $0x108] sm:$0xff] }
  0x1c   :  { %184 = vmatpush.msra.mxu2 %v1562_v18  ;;  %204 = vmatpush.msra.mxu3 %v1564_v19  ;;  %v1607_v33 = vld [vmem:[#allocation6 + $0x100] sm:$0xff]  ;;  %v1610_v34 = vld [vmem:[#allocation6 + $0xd0] sm:$0xff]  ;;  %v1612_v35 = vld [vmem:[#allocation6 + $0xd8] sm:$0xff] }
  0x1d   :  { %164 = vmatpush.msra.mxu1 %v1581_v24  ;;  %144 = vmatpush.msra.mxu0 %v1583_v25  ;;  %v1617_v36 = vld [vmem:[#allocation6 + $0xe8] sm:$0xff]  ;;  %v1619_v37 = vld [vmem:[#allocation6 + $0xe0] sm:$0xff]  ;;  %v1622_v38 = vld [vmem:[#allocation6 + $0xb0] sm:$0xff] }
  0x1e   :  { %185 = vmatpush.msra.mxu2 %v1574_v22  ;;  %205 = vmatpush.msra.mxu3 %v1576_v23  ;;  %2477 = vst [vmem:[#allocation12_spill] sm:$0xff] %v1622_v38  ;;  %v1624_v39 = vld [vmem:[#allocation6 + $0xb8] sm:$0xff]  ;;  %v1629_v40 = vld [vmem:[#allocation6 + $0xc8] sm:$0xff]  ;;  %v1631_v41 = vld [vmem:[#allocation6 + $0xc0] sm:$0xff] }
  0x1f   :  { %165 = vmatpush.msra.mxu1 %v1593_v28  ;;  %145 = vmatpush.msra.mxu0 %v1595_v29  ;;  %2478 = vst [vmem:[#allocation13_spill] sm:$0xff] %v1624_v39  ;;  %v1634_v42 = vld [vmem:[#allocation6 + $0x90] sm:$0xff]  ;;  %v1636_v43 = vld [vmem:[#allocation6 + $0x98] sm:$0xff]  ;;  %v1641_v44 = vld [vmem:[#allocation6 + $0xa8] sm:$0xff] }
  0x20   :  { %186 = vmatpush.msra.mxu2 %v1586_v26  ;;  %206 = vmatpush.msra.mxu3 %v1588_v27  ;;  %2479 = vst [vmem:[#allocation14_spill] sm:$0xff] %v1634_v42  ;;  %v1643_v45 = vld [vmem:[#allocation6 + $0xa0] sm:$0xff]  ;;  %v1646_v46 = vld [vmem:[#allocation6 + $0x70] sm:$0xff]  ;;  %v1648_v47 = vld [vmem:[#allocation6 + $0x78] sm:$0xff] }
  0x21   :  { %166 = vmatpush.msra.mxu1 %v1605_v32  ;;  %146 = vmatpush.msra.mxu0 %v1607_v33  ;;  %2480 = vst [vmem:[#allocation15_spill] sm:$0xff] %v1636_v43  ;;  %v1653_v48 = vld [vmem:[#allocation6 + $0x88] sm:$0xff]  ;;  %v1655_v49 = vld [vmem:[#allocation6 + $0x80] sm:$0xff]  ;;  %v1658_v50 = vld [vmem:[#allocation6 + $0x50] sm:$0xff] }
  0x22   :  { %187 = vmatpush.msra.mxu2 %v1598_v30  ;;  %207 = vmatpush.msra.mxu3 %v1600_v31  ;;  %2481 = vst [vmem:[#allocation16_spill] sm:$0xff] %v1646_v46  ;;  %v1660_v51 = vld [vmem:[#allocation6 + $0x58] sm:$0xff]  ;;  %v1665_v52 = vld [vmem:[#allocation6 + $0x68] sm:$0xff]  ;;  %v1667_v53 = vld [vmem:[#allocation6 + $0x60] sm:$0xff] }
  0x23   :  { %167 = vmatpush.msra.mxu1 %v1617_v36  ;;  %147 = vmatpush.msra.mxu0 %v1619_v37  ;;  %2482 = vst [vmem:[#allocation17_spill] sm:$0xff] %v1648_v47  ;;  %v1670_v54 = vld [vmem:[#allocation6 + $0x30] sm:$0xff]  ;;  %v1672_v55 = vld [vmem:[#allocation6 + $0x38] sm:$0xff]  ;;  %v1677_v56 = vld [vmem:[#allocation6 + $0x48] sm:$0xff] }
  0x24   :  { %188 = vmatpush.msra.mxu2 %v1610_v34  ;;  %208 = vmatpush.msra.mxu3 %v1612_v35  ;;  %2483 = vst [vmem:[#allocation18_spill] sm:$0xff] %v1653_v48  ;;  %v1679_v57 = vld [vmem:[#allocation6 + $0x40] sm:$0xff]  ;;  %v1682_v58 = vld [vmem:[#allocation6 + $0x10] sm:$0xff]  ;;  %v1684_v59 = vld [vmem:[#allocation6 + $0x18] sm:$0xff] }
  0x25   :  { %168 = vmatpush.msra.mxu1 %v1629_v40  ;;  %148 = vmatpush.msra.mxu0 %v1631_v41  ;;  %2484 = vst [vmem:[#allocation19_spill] sm:$0xff] %v1655_v49  ;;  %v1691_v60 = vld [vmem:[#allocation6 + $0x28] sm:$0xff]  ;;  %v1693_v61 = vld [vmem:[#allocation6 + $0x20] sm:$0xff] }
  0x26   :  { %189 = vmatpush.msra.mxu2 %v1622_v38  ;;  %209 = vmatpush.msra.mxu3 %v1624_v39  ;;  %2485 = vst [vmem:[#allocation20_spill] sm:$0xff] %v1658_v50  ;;  %v1697_v63 = vld [vmem:[#allocation6 + $0x8] sm:$0xff] }
  0x27   :  { %169 = vmatpush.msra.mxu1 %v1641_v44  ;;  %2486 = vst [vmem:[#allocation21_spill] sm:$0xff] %v1660_v51  ;;  %149 = vmatpush.msra.mxu0 %v1643_v45 }
  0x28   :  { %190 = vmatpush.msra.mxu2 %v1634_v42  ;;  %210 = vmatpush.msra.mxu3 %v1636_v43  ;;  %2487 = vst [vmem:[#allocation22_spill] sm:$0xff] %v1665_v52 }
  0x29   :  { %2488 = vst [vmem:[#allocation23_spill] sm:$0xff] %v1667_v53  ;;  %170 = vmatpush.msra.mxu1 %v1653_v48  ;;  %150 = vmatpush.msra.mxu0 %v1655_v49 }
  0x2a   :  { %191 = vmatpush.msra.mxu2 %v1646_v46  ;;  %211 = vmatpush.msra.mxu3 %v1648_v47  ;;  %2489 = vst [vmem:[#allocation24_spill] sm:$0xff] %v1670_v54 }
  0x2b   :  { %2490 = vst [vmem:[#allocation25_spill] sm:$0xff] %v1672_v55  ;;  %171 = vmatpush.msra.mxu1 %v1665_v52  ;;  %151 = vmatpush.msra.mxu0 %v1667_v53 }
  0x2c   :  { %192 = vmatpush.msra.mxu2 %v1658_v50  ;;  %212 = vmatpush.msra.mxu3 %v1660_v51  ;;  %2491 = vst [vmem:[#allocation26_spill] sm:$0xff] %v1677_v56 }
  0x2d   :  { %2492 = vst [vmem:[#allocation27_spill] sm:$0xff] %v1679_v57  ;;  %172 = vmatpush.msra.mxu1 %v1677_v56  ;;  %152 = vmatpush.msra.mxu0 %v1679_v57 }
  0x2e   :  { %2493 = vst [vmem:[#allocation28_spill] sm:$0xff] %v1682_v58  ;;  %193 = vmatpush.msra.mxu2 %v1670_v54  ;;  %213 = vmatpush.msra.mxu3 %v1672_v55  ;;  %v1699_v54 = vld [vmem:[#allocation6] sm:$0xff] }
  0x2f   :  { %2494 = vst [vmem:[#allocation29_spill] sm:$0xff] %v1684_v59  ;;  %173 = vmatpush.msra.mxu1 %v1691_v60  ;;  %153 = vmatpush.msra.mxu0 %v1693_v61 }
  0x30   :  { %2495 = vst [vmem:[#allocation30_spill] sm:$0xff] %v1691_v60  ;;  %194 = vmatpush.msra.mxu2 %v1682_v58  ;;  %214 = vmatpush.msra.mxu3 %v1684_v59 }
  0x31   :  { %2496 = vst [vmem:[#allocation31_spill] sm:$0xff] %v1693_v61  ;;  %195 = vmatmul.f32.vlgmr.msra.gmra.mxu2 %v1468_v62  ;;  %215 = vmatmul.f32.vlgmr.msra.gmra.mxu3 %v1468_v62 }
  0x32   :  { %2497 = vst [vmem:[#allocation32_spill] sm:$0xff] %v1697_v63  ;;  %316 = vmatpush.msrb.mxu2 %v1513_v0  ;;  %336 = vmatpush.msrb.mxu3 %v1515_v1 }
  0x33   :  { %2498 = vst [vmem:[#allocation33_spill] sm:$0xff] %v1699_v54  ;;  %174 = vmatpush.msra.mxu1 %v1697_v63  ;;  %154 = vmatpush.msra.mxu0 %v1699_v54 }
  0x34   :  { %175 = vmatmul.f32.vlgmr.msra.gmra.mxu1 %v1468_v62  ;;  %155 = vmatmul.f32.vlgmr.msra.gmra.mxu0 %v1468_v62  ;;  %v2499_v62 = vld [vmem:[#allocation24_spill] sm:$0xff] }
  0x35   :  { %276 = vmatpush.msrb.mxu0 %v1531_v7  ;;  %296 = vmatpush.msrb.mxu1 %v1527_v6 }
  0x36   :  { %317 = vmatpush.msrb.mxu2 %v1517_v2  ;;  %337 = vmatpush.msrb.mxu3 %v1521_v3 }
  0x37   :  { %277 = vmatpush.msrb.mxu0 %v1541_v11  ;;  %297 = vmatpush.msrb.mxu1 %v1533_v8 }
  0x38   :  { %318 = vmatpush.msrb.mxu2 %v1523_v4  ;;  %338 = vmatpush.msrb.mxu3 %v1525_v5 }
  0x39   :  { %278 = vmatpush.msrb.mxu0 %v1547_v13  ;;  %298 = vmatpush.msrb.mxu1 %v1545_v12 }
  0x3a   :  { %319 = vmatpush.msrb.mxu2 %v1536_v9  ;;  %339 = vmatpush.msrb.mxu3 %v1538_v10 }
  0x3b   :  { %279 = vmatpush.msrb.mxu0 %v1559_v17  ;;  %299 = vmatpush.msrb.mxu1 %v1557_v16 }
  0x3c   :  { %320 = vmatpush.msrb.mxu2 %v1550_v14  ;;  %340 = vmatpush.msrb.mxu3 %v1552_v15 }
  0x3d   :  { %280 = vmatpush.msrb.mxu0 %v1571_v21  ;;  %300 = vmatpush.msrb.mxu1 %v1569_v20 }
  0x3e   :  { %321 = vmatpush.msrb.mxu2 %v1562_v18  ;;  %341 = vmatpush.msrb.mxu3 %v1564_v19 }
  0x3f   :  { %281 = vmatpush.msrb.mxu0 %v1583_v25  ;;  %301 = vmatpush.msrb.mxu1 %v1581_v24 }
  0x40   :  { %322 = vmatpush.msrb.mxu2 %v1574_v22  ;;  %342 = vmatpush.msrb.mxu3 %v1576_v23 }
  0x41   :  { %282 = vmatpush.msrb.mxu0 %v1595_v29  ;;  %302 = vmatpush.msrb.mxu1 %v1593_v28 }
  0x42   :  { %323 = vmatpush.msrb.mxu2 %v1586_v26  ;;  %343 = vmatpush.msrb.mxu3 %v1588_v27 }
  0x43   :  { %283 = vmatpush.msrb.mxu0 %v1607_v33  ;;  %303 = vmatpush.msrb.mxu1 %v1605_v32 }
  0x44   :  { %324 = vmatpush.msrb.mxu2 %v1598_v30  ;;  %344 = vmatpush.msrb.mxu3 %v1600_v31 }
  0x45   :  { %284 = vmatpush.msrb.mxu0 %v1619_v37  ;;  %304 = vmatpush.msrb.mxu1 %v1617_v36 }
  0x46   :  { %325 = vmatpush.msrb.mxu2 %v1610_v34  ;;  %345 = vmatpush.msrb.mxu3 %v1612_v35 }
  0x47   :  { %285 = vmatpush.msrb.mxu0 %v1631_v41  ;;  %305 = vmatpush.msrb.mxu1 %v1629_v40 }
  0x48   :  { %326 = vmatpush.msrb.mxu2 %v1622_v38  ;;  %346 = vmatpush.msrb.mxu3 %v1624_v39 }
  0x49   :  { %286 = vmatpush.msrb.mxu0 %v1643_v45  ;;  %306 = vmatpush.msrb.mxu1 %v1641_v44 }
  0x4a   :  { %327 = vmatpush.msrb.mxu2 %v1634_v42  ;;  %347 = vmatpush.msrb.mxu3 %v1636_v43 }
  0x4b   :  { %287 = vmatpush.msrb.mxu0 %v1655_v49  ;;  %307 = vmatpush.msrb.mxu1 %v1653_v48 }
  0x4c   :  { %328 = vmatpush.msrb.mxu2 %v1646_v46  ;;  %348 = vmatpush.msrb.mxu3 %v1648_v47 }
  0x4d   :  { %288 = vmatpush.msrb.mxu0 %v1667_v53  ;;  %308 = vmatpush.msrb.mxu1 %v1665_v52 }
  0x4e   :  { %329 = vmatpush.msrb.mxu2 %v1658_v50  ;;  %349 = vmatpush.msrb.mxu3 %v1660_v51 }
  0x4f   :  { %289 = vmatpush.msrb.mxu0 %v1679_v57  ;;  %309 = vmatpush.msrb.mxu1 %v1677_v56 }
  0x50   :  { %330 = vmatpush.msrb.mxu2 %v2499_v62  ;;  %350 = vmatpush.msrb.mxu3 %v1672_v55 }
  0x51   :  { %290 = vmatpush.msrb.mxu0 %v1693_v61  ;;  %310 = vmatpush.msrb.mxu1 %v1691_v60 }
  0x52   :  { %331 = vmatpush.msrb.mxu2 %v1682_v58  ;;  %351 = vmatpush.msrb.mxu3 %v1684_v59 }
  0x53   :  { %291 = vmatpush.msrb.mxu0 %v1699_v54  ;;  %311 = vmatpush.msrb.mxu1 %v1697_v63 }
  0x54   :  { %450 = vmatpush.msra.mxu2 %v1513_v0  ;;  %470 = vmatpush.msra.mxu3 %v1515_v1 }
  0x55   :  { %410 = vmatpush.msra.mxu0 %v1531_v7  ;;  %430 = vmatpush.msra.mxu1 %v1527_v6 }
  0x56   :  { %451 = vmatpush.msra.mxu2 %v1517_v2  ;;  %471 = vmatpush.msra.mxu3 %v1521_v3 }
  0x57   :  { %411 = vmatpush.msra.mxu0 %v1541_v11  ;;  %431 = vmatpush.msra.mxu1 %v1533_v8 }
  0x58   :  { %452 = vmatpush.msra.mxu2 %v1523_v4  ;;  %472 = vmatpush.msra.mxu3 %v1525_v5 }
  0x59   :  { %412 = vmatpush.msra.mxu0 %v1547_v13  ;;  %432 = vmatpush.msra.mxu1 %v1545_v12 }
  0x5a   :  { %453 = vmatpush.msra.mxu2 %v1536_v9  ;;  %473 = vmatpush.msra.mxu3 %v1538_v10 }
  0x5b   :  { %413 = vmatpush.msra.mxu0 %v1559_v17  ;;  %433 = vmatpush.msra.mxu1 %v1557_v16 }
  0x5c   :  { %454 = vmatpush.msra.mxu2 %v1550_v14  ;;  %474 = vmatpush.msra.mxu3 %v1552_v15 }
  0x5d   :  { %414 = vmatpush.msra.mxu0 %v1571_v21  ;;  %434 = vmatpush.msra.mxu1 %v1569_v20 }
  0x5e   :  { %455 = vmatpush.msra.mxu2 %v1562_v18  ;;  %475 = vmatpush.msra.mxu3 %v1564_v19 }
  0x5f   :  { %415 = vmatpush.msra.mxu0 %v1583_v25  ;;  %435 = vmatpush.msra.mxu1 %v1581_v24 }
  0x60   :  { %456 = vmatpush.msra.mxu2 %v1574_v22  ;;  %476 = vmatpush.msra.mxu3 %v1576_v23 }
  0x61   :  { %416 = vmatpush.msra.mxu0 %v1595_v29  ;;  %436 = vmatpush.msra.mxu1 %v1593_v28 }
  0x62   :  { %457 = vmatpush.msra.mxu2 %v1586_v26  ;;  %477 = vmatpush.msra.mxu3 %v1588_v27 }
  0x63   :  { %417 = vmatpush.msra.mxu0 %v1607_v33  ;;  %437 = vmatpush.msra.mxu1 %v1605_v32 }
  0x64   :  { %458 = vmatpush.msra.mxu2 %v1598_v30  ;;  %478 = vmatpush.msra.mxu3 %v1600_v31 }
  0x65   :  { %418 = vmatpush.msra.mxu0 %v1619_v37  ;;  %438 = vmatpush.msra.mxu1 %v1617_v36 }
  0x66   :  { %459 = vmatpush.msra.mxu2 %v1610_v34  ;;  %479 = vmatpush.msra.mxu3 %v1612_v35 }
  0x67   :  { %419 = vmatpush.msra.mxu0 %v1631_v41  ;;  %439 = vmatpush.msra.mxu1 %v1629_v40 }
  0x68   :  { %460 = vmatpush.msra.mxu2 %v1622_v38  ;;  %480 = vmatpush.msra.mxu3 %v1624_v39 }
  0x69   :  { %420 = vmatpush.msra.mxu0 %v1643_v45  ;;  %440 = vmatpush.msra.mxu1 %v1641_v44 }
  0x6a   :  { %461 = vmatpush.msra.mxu2 %v1634_v42  ;;  %481 = vmatpush.msra.mxu3 %v1636_v43 }
  0x6b   :  { %421 = vmatpush.msra.mxu0 %v1655_v49  ;;  %441 = vmatpush.msra.mxu1 %v1653_v48 }
  0x6c   :  { %462 = vmatpush.msra.mxu2 %v1646_v46  ;;  %482 = vmatpush.msra.mxu3 %v1648_v47 }
  0x6d   :  { %422 = vmatpush.msra.mxu0 %v1667_v53  ;;  %442 = vmatpush.msra.mxu1 %v1665_v52 }
  0x6e   :  { %463 = vmatpush.msra.mxu2 %v1658_v50  ;;  %483 = vmatpush.msra.mxu3 %v1660_v51  ;;  %v1836_v51 = vld [vmem:[%s2394_s1] sm:$0xf] }
  0x6f   :  { %423 = vmatpush.msra.mxu0 %v1679_v57  ;;  %443 = vmatpush.msra.mxu1 %v1677_v56  ;;  %2500 = vst [vmem:[#allocation34_spill] sm:$0xff] %v1836_v51 }
  0x70   :  { %464 = vmatpush.msra.mxu2 %v2499_v62  ;;  %484 = vmatpush.msra.mxu3 %v1672_v55  ;;  %v1839_v62 = vld [vmem:[#allocation7] sm:$0xf] }
  0x71   :  { %424 = vmatpush.msra.mxu0 %v1693_v61  ;;  %444 = vmatpush.msra.mxu1 %v1691_v60  ;;  %v72_v61 = vstv %s71_s2 }
  0x72   :  { %465 = vmatpush.msra.mxu2 %v1682_v58  ;;  %485 = vmatpush.msra.mxu3 %v1684_v59  ;;  %v73_v60 = vmul.f32 %v72_v61, %v1836_v51 }
  0x73   :  { %425 = vmatpush.msra.mxu0 %v1699_v54  ;;  %445 = vmatpush.msra.mxu1 %v1697_v63 }
  0x74   :  { %v74_v59 = vadd.f32 %v73_v60, %v1839_v62 }
  0xb1   :  { %v176_v55 = vpop.f32.mrf.mxu1  ;;  %v156_v50 = vpop.f32.mrf.mxu0 }
  0xb2   :  { %v223_v54 = vrot.slane %v176_v55, 7 }
  0xb4   :  { %v196_v63 = vpop.f32.mrf.mxu2  ;;  %v216_v56 = vpop.f32.mrf.mxu3  ;;  %v227_v47 = vsel %vm226_vm0, %v156_v50, %v223_v54 }
  0xb5   :  { %v224_v58 = vrot.slane %v196_v63, 6  ;;  %v225_v57 = vrot.slane %v216_v56, 5 }
  0xb7   :  { %v229_v46 = vsel %vm228_vm1, %v224_v58, %v225_v57 }
  0xb8   :  { %v231_v61 = vsel %vm230_vm2, %v227_v47, %v229_v46 }
  0xb9   :  { %v233_v51 = vadd.f32 %v231_v61, %v74_v59 }
  0xbb   :  { %v1248_v52 = vmul.f32 -1.442695, %v233_v51 }
  0xbd   :  { %1279 = vpow2.f32 %v1248_v52 }
  0xc3   :  { %v1280_v53 = vpop.eup %1279 }
  0xc4   :  { %v237_v43 = vadd.f32 1.0, %v1280_v53 }
  0xc6   :  { %1281 = vrcp.f32 %v237_v43  ;;  %v249_v49 = vand.u32 2147483648, %v237_v43  ;;  %v247_v56 = vand.u32 2147483647, %v237_v43  ;;  %vm243_vm4 = vweird.f32 %v237_v43 }
  0xc8   :  { %v250_v54 = vor.u32 1.1754944e-38, %v249_v49  ;;  %vm248_vm6 = vcmp.eq.f32.partialorder %v247_v56, 8.507059e+37  ;;  %v2502_v49 = vld [vmem:[#allocation18_spill] sm:$0xff]  ;;  %v2505_v56 = vld [vmem:[#allocation23_spill] sm:$0xff] }
  0xcc   :  { %v1282_v55 = vpop.eup %1281 }
  0xcd   :  { %v239_v42 = vmul.f32 %v1282_v55, %v237_v43  ;;  %vm244_vm3 = vweird.f32 %v1282_v55  ;;  %v2501_v43 = vld [vmem:[#allocation19_spill] sm:$0xff] }
  0xce   :  { %vm245_vm5 = vmor %vm243_vm4, %vm244_vm3 }
  0xcf   :  { %v240_v48 = vsub.f32 1.0, %v239_v42 }
  0xd1   :  { %v241_v60 = vmul.f32 %v1282_v55, %v240_v48 }
  0xd3   :  { %v242_v50 = vadd.f32 %v1282_v55, %v241_v60  ;;  %v2504_v60 = vld [vmem:[#allocation15_spill] sm:$0xff] }
  0xd5   :  { %v246_v57 = vsel %vm245_vm5, %v1282_v55, %v242_v50  ;;  %v2503_v55 = vld [vmem:[#allocation14_spill] sm:$0xff] }
  0xd6   :  { %v251_v46 = vsel %vm248_vm6, %v250_v54, %v246_v57  ;;  %v2506_v50 = vld [vmem:[#allocation22_spill] sm:$0xff]  ;;  %v2507_v54 = vld [vmem:[#allocation16_spill] sm:$0xff]  ;;  %v2508_v57 = vld [vmem:[#allocation17_spill] sm:$0xff] }
  0xd7   :  { %v254_v47 = vrot.slane %v251_v46, 2  ;;  %v258_v52 = vrot.slane %v251_v46, 1  ;;  %v264_v42 = vrot.slane %v251_v46, 3 }
  0xd9   :  { %v256_v51 = vmul.f32 2.0, %v254_v47  ;;  %v260_v53 = vmul.f32 0.0, %v258_v52  ;;  %v2510_v47 = vld [vmem:[#allocation26_spill] sm:$0xff]  ;;  %v2512_v52 = vld [vmem:[#allocation21_spill] sm:$0xff] }
  0xdb   :  { %v1249_v58 = vadd.f32 -1.0, %v256_v51  ;;  %v2511_v51 = vld [vmem:[#allocation20_spill] sm:$0xff] }
  0xdd   :  { %v261_v59 = vmul.f32 %v1249_v58, %v251_v46  ;;  %v2509_v46 = vld [vmem:[#allocation27_spill] sm:$0xff] }
  0xde   :  { %v2513_v58 = vld [vmem:[#allocation31_spill] sm:$0xff] }
  0xdf   :  { %v1845_v63 = vadd.f32 %v261_v59, %v260_v53  ;;  %v2514_v53 = vld [vmem:[#allocation30_spill] sm:$0xff]  ;;  %v2515_v59 = vld [vmem:[#allocation24_spill] sm:$0xff] }
  0xe1   :  { %1283 = vtanh.f32 %v1845_v63 }
  0xe7   :  { %v1284_v48 = vpop.eup %1283 }
  0xe8   :  { %v1848_v61 = vmul.f32 %v1284_v48, %v264_v42  ;;  %v2516_v42 = vld [vmem:[#allocation25_spill] sm:$0xff] }
  0xe9   :  { %v2517_v48 = vld [vmem:[#allocation33_spill] sm:$0xff] }
  0xea   :  { %292 = vmatmul.f32.vlgmr.msrb.gmra.mxu0 %v1848_v61  ;;  %312 = vmatmul.f32.vlgmr.msrb.gmra.mxu1 %v1848_v61 }
  0xeb   :  { %332 = vmatmul.f32.vlgmr.msrb.gmra.mxu2 %v1848_v61  ;;  %352 = vmatmul.f32.vlgmr.msrb.gmra.mxu3 %v1848_v61 }
  0xec   :  { %544 = vmatpush.msrb.mxu0 %v1531_v7  ;;  %564 = vmatpush.msrb.mxu1 %v1527_v6 }
  0xed   :  { %584 = vmatpush.msrb.mxu2 %v1513_v0  ;;  %604 = vmatpush.msrb.mxu3 %v1515_v1 }
  0xee   :  { %545 = vmatpush.msrb.mxu0 %v1541_v11  ;;  %565 = vmatpush.msrb.mxu1 %v1533_v8 }
  0xef   :  { %585 = vmatpush.msrb.mxu2 %v1517_v2  ;;  %605 = vmatpush.msrb.mxu3 %v1521_v3 }
  0xf0   :  { %546 = vmatpush.msrb.mxu0 %v1547_v13  ;;  %566 = vmatpush.msrb.mxu1 %v1545_v12 }
  0xf1   :  { %586 = vmatpush.msrb.mxu2 %v1523_v4  ;;  %606 = vmatpush.msrb.mxu3 %v1525_v5 }
  0xf2   :  { %547 = vmatpush.msrb.mxu0 %v1559_v17  ;;  %567 = vmatpush.msrb.mxu1 %v1557_v16 }
  0xf3   :  { %587 = vmatpush.msrb.mxu2 %v1536_v9  ;;  %607 = vmatpush.msrb.mxu3 %v1538_v10 }
  0xf4   :  { %548 = vmatpush.msrb.mxu0 %v1571_v21  ;;  %568 = vmatpush.msrb.mxu1 %v1569_v20 }
  0xf5   :  { %588 = vmatpush.msrb.mxu2 %v1550_v14  ;;  %608 = vmatpush.msrb.mxu3 %v1552_v15 }
  0xf6   :  { %549 = vmatpush.msrb.mxu0 %v1583_v25  ;;  %569 = vmatpush.msrb.mxu1 %v1581_v24 }
  0xf7   :  { %589 = vmatpush.msrb.mxu2 %v1562_v18  ;;  %609 = vmatpush.msrb.mxu3 %v1564_v19 }
  0xf8   :  { %550 = vmatpush.msrb.mxu0 %v1595_v29  ;;  %570 = vmatpush.msrb.mxu1 %v1593_v28 }
  0xf9   :  { %590 = vmatpush.msrb.mxu2 %v1574_v22  ;;  %610 = vmatpush.msrb.mxu3 %v1576_v23 }
  0xfa   :  { %551 = vmatpush.msrb.mxu0 %v1607_v33  ;;  %571 = vmatpush.msrb.mxu1 %v1605_v32 }
  0xfb   :  { %591 = vmatpush.msrb.mxu2 %v1586_v26  ;;  %611 = vmatpush.msrb.mxu3 %v1588_v27 }
  0xfc   :  { %552 = vmatpush.msrb.mxu0 %v1619_v37  ;;  %572 = vmatpush.msrb.mxu1 %v1617_v36 }
  0xfd   :  { %592 = vmatpush.msrb.mxu2 %v1598_v30  ;;  %612 = vmatpush.msrb.mxu3 %v1600_v31 }
  0xfe   :  { %553 = vmatpush.msrb.mxu0 %v1631_v41  ;;  %573 = vmatpush.msrb.mxu1 %v1629_v40 }
  0xff   :  { %593 = vmatpush.msrb.mxu2 %v1610_v34  ;;  %613 = vmatpush.msrb.mxu3 %v1612_v35 }
 0x100   :  { %554 = vmatpush.msrb.mxu0 %v1643_v45  ;;  %574 = vmatpush.msrb.mxu1 %v1641_v44 }
 0x101   :  { %594 = vmatpush.msrb.mxu2 %v1622_v38  ;;  %614 = vmatpush.msrb.mxu3 %v1624_v39 }
 0x102   :  { %555 = vmatpush.msrb.mxu0 %v2501_v43  ;;  %575 = vmatpush.msrb.mxu1 %v2502_v49 }
 0x103   :  { %595 = vmatpush.msrb.mxu2 %v2503_v55  ;;  %615 = vmatpush.msrb.mxu3 %v2504_v60 }
 0x104   :  { %556 = vmatpush.msrb.mxu0 %v2505_v56  ;;  %576 = vmatpush.msrb.mxu1 %v2506_v50 }
 0x105   :  { %596 = vmatpush.msrb.mxu2 %v2507_v54  ;;  %616 = vmatpush.msrb.mxu3 %v2508_v57  ;;  %v2518_v54 = vld [vmem:[#allocation32_spill] sm:$0xff] }
 0x106   :  { %557 = vmatpush.msrb.mxu0 %v2509_v46  ;;  %577 = vmatpush.msrb.mxu1 %v2510_v47  ;;  %v2519_v57 = vld [vmem:[#allocation28_spill] sm:$0xff]  ;;  %v2520_v46 = vld [vmem:[#allocation29_spill] sm:$0xff] }
 0x107   :  { %597 = vmatpush.msrb.mxu2 %v2511_v51  ;;  %617 = vmatpush.msrb.mxu3 %v2512_v52  ;;  %v273_v51 = vstv %s1250_s13  ;;  %v2521_v52 = vld [vmem:[#allocation34_spill] sm:$0xff] }
 0x108   :  { %558 = vmatpush.msrb.mxu0 %v2513_v58  ;;  %578 = vmatpush.msrb.mxu1 %v2514_v53  ;;  %v274_v50 = vmul.f32 %v273_v51, %v2521_v52 }
 0x109   :  { %598 = vmatpush.msrb.mxu2 %v2515_v59  ;;  %618 = vmatpush.msrb.mxu3 %v2516_v42 }
 0x10a   :  { %559 = vmatpush.msrb.mxu0 %v2517_v48  ;;  %579 = vmatpush.msrb.mxu1 %v2518_v54  ;;  %v275_v59 = vadd.f32 %v274_v50, %v1839_v62 }
 0x10b   :  { %599 = vmatpush.msrb.mxu2 %v2519_v57  ;;  %619 = vmatpush.msrb.mxu3 %v2520_v46 }
 0x167   :  { %v313_v47 = vpop.f32.mrf.mxu1  ;;  %v293_v55 = vpop.f32.mrf.mxu0 }
 0x168   :  { %v360_v58 = vrot.slane %v313_v47, 7 }
 0x16a   :  { %v363_v48 = vsel %vm226_vm0, %v293_v55, %v360_v58 }
 0x16e   :  { %v333_v56 = vpop.f32.mrf.mxu2  ;;  %v353_v53 = vpop.f32.mrf.mxu3 }
 0x16f   :  { %v361_v60 = vrot.slane %v333_v56, 6  ;;  %v362_v42 = vrot.slane %v353_v53, 5 }
 0x171   :  { %v364_v54 = vsel %vm228_vm1, %v361_v60, %v362_v42 }
 0x172   :  { %v365_v57 = vsel %vm230_vm2, %v363_v48, %v364_v54  ;;  %v69_v48 = vlaneseq }
 0x173   :  { %v367_v46 = vadd.f32 %v365_v57, %v275_v59 }
 0x175   :  { %v1251_v49 = vmul.f32 -1.442695, %v367_v46 }
 0x177   :  { %1285 = vpow2.f32 %v1251_v49 }
 0x17d   :  { %v1286_v43 = vpop.eup %1285 }
 0x17e   :  { %v371_v39 = vadd.f32 1.0, %v1286_v43 }
 0x180   :  { %1287 = vrcp.f32 %v371_v39  ;;  %v383_v56 = vand.u32 2147483648, %v371_v39  ;;  %v381_v50 = vand.u32 2147483647, %v371_v39  ;;  %vm377_vm8 = vweird.f32 %v371_v39 }
 0x182   :  { %v384_v55 = vor.u32 1.1754944e-38, %v383_v56  ;;  %vm382_vm10 = vcmp.eq.f32.partialorder %v381_v50, 8.507059e+37 }
 0x186   :  { %v1288_v47 = vpop.eup %1287 }
 0x187   :  { %v373_v51 = vmul.f32 %v1288_v47, %v371_v39  ;;  %vm378_vm7 = vweird.f32 %v1288_v47 }
 0x188   :  { %vm379_vm9 = vmor %vm377_vm8, %vm378_vm7 }
 0x189   :  { %v374_v52 = vsub.f32 1.0, %v373_v51 }
 0x18b   :  { %v375_v38 = vmul.f32 %v1288_v47, %v374_v52  ;;  %v1927_v52 = vshrl.u32 %v69_v48, 7 }
 0x18d   :  { %v376_v53 = vadd.f32 %v1288_v47, %v375_v38  ;;  %vm267_vm11 = vcmp.eq.s32.totalorder %v1927_v52, 0  ;;  %vm401_vm12 = vcmp.eq.s32.totalorder %v1927_v52, 1  ;;  %vm535_vm4 = vcmp.eq.s32.totalorder %v1927_v52, 2 }
 0x18f   :  { %v380_v60 = vsel %vm379_vm9, %v1288_v47, %v376_v53  ;;  %v269_v47 = vperm.slane %v1848_v61, 0  ;;  %vm669_vm9 = vcmp.eq.s32.totalorder %v1927_v52, 3 }
 0x190   :  { %v385_v54 = vsel %vm382_vm10, %v384_v55, %v380_v60 }
 0x191   :  { %v388_v57 = vrot.slane %v385_v54, 2  ;;  %v392_v49 = vrot.slane %v385_v54, 1  ;;  %v398_v38 = vrot.slane %v385_v54, 3  ;;  %v271_v56 = vsel %vm267_vm11, %v269_v47, 0.0 }
 0x193   :  { %v390_v46 = vmul.f32 2.0, %v388_v57  ;;  %v394_v43 = vmul.f32 %v392_v49, %v1845_v63 }
 0x195   :  { %v1252_v58 = vadd.f32 -1.0, %v390_v46 }
 0x197   :  { %v395_v59 = vmul.f32 %v1252_v58, %v385_v54 }
 0x199   :  { %v1924_v42 = vadd.f32 %v395_v59, %v394_v43 }
 0x19b   :  { %1289 = vtanh.f32 %v1924_v42 }
 0x1a1   :  { %v1290_v39 = vpop.eup %1289 }
 0x1a2   :  { %v400_v51 = vmul.f32 %v1290_v39, %v398_v38 }
 0x1a4   :  { %426 = vmatmul.f32.vlgmr.msra.gmra.mxu0 %v400_v51  ;;  %446 = vmatmul.f32.vlgmr.msra.gmra.mxu1 %v400_v51  ;;  %v403_v63 = vperm.slane %v400_v51, 0 }
 0x1a5   :  { %466 = vmatmul.f32.vlgmr.msra.gmra.mxu2 %v400_v51  ;;  %486 = vmatmul.f32.vlgmr.msra.gmra.mxu3 %v400_v51 }
 0x1a6   :  { %678 = vmatpush.msra.mxu0 %v1531_v7  ;;  %698 = vmatpush.msra.mxu1 %v1527_v6  ;;  %v1934_v50 = vsel %vm401_vm12, %v403_v63, %v271_v56  ;;  %v2528_v6 = vld [vmem:[#allocation23_spill] sm:$0xff]  ;;  %v2529_v7 = vld [vmem:[#allocation22_spill] sm:$0xff] }
 0x1a7   :  { %718 = vmatpush.msra.mxu2 %v1513_v0  ;;  %738 = vmatpush.msra.mxu3 %v1515_v1  ;;  %v2522_v0 = vld [vmem:[#allocation12_spill] sm:$0xff]  ;;  %v2523_v1 = vld [vmem:[#allocation13_spill] sm:$0xff] }
 0x1a8   :  { %679 = vmatpush.msra.mxu0 %v1541_v11  ;;  %699 = vmatpush.msra.mxu1 %v1533_v8  ;;  %v2530_v8 = vld [vmem:[#allocation16_spill] sm:$0xff]  ;;  %v2533_v11 = vld [vmem:[#allocation26_spill] sm:$0xff] }
 0x1a9   :  { %719 = vmatpush.msra.mxu2 %v1517_v2  ;;  %739 = vmatpush.msra.mxu3 %v1521_v3  ;;  %v2524_v2 = vld [vmem:[#allocation19_spill] sm:$0xff]  ;;  %v2525_v3 = vld [vmem:[#allocation18_spill] sm:$0xff] }
 0x1aa   :  { %680 = vmatpush.msra.mxu0 %v1547_v13  ;;  %700 = vmatpush.msra.mxu1 %v1545_v12  ;;  %v2534_v12 = vld [vmem:[#allocation20_spill] sm:$0xff]  ;;  %v2535_v13 = vld [vmem:[#allocation21_spill] sm:$0xff] }
 0x1ab   :  { %720 = vmatpush.msra.mxu2 %v1523_v4  ;;  %740 = vmatpush.msra.mxu3 %v1525_v5  ;;  %v2526_v4 = vld [vmem:[#allocation14_spill] sm:$0xff]  ;;  %v2527_v5 = vld [vmem:[#allocation15_spill] sm:$0xff] }
 0x1ac   :  { %681 = vmatpush.msra.mxu0 %v1559_v17  ;;  %701 = vmatpush.msra.mxu1 %v1557_v16  ;;  %v2538_v16 = vld [vmem:[#allocation24_spill] sm:$0xff]  ;;  %v2539_v17 = vld [vmem:[#allocation25_spill] sm:$0xff] }
 0x1ad   :  { %721 = vmatpush.msra.mxu2 %v1536_v9  ;;  %741 = vmatpush.msra.mxu3 %v1538_v10  ;;  %v2531_v9 = vld [vmem:[#allocation17_spill] sm:$0xff]  ;;  %v2532_v10 = vld [vmem:[#allocation27_spill] sm:$0xff] }
 0x1ae   :  { %682 = vmatpush.msra.mxu0 %v1571_v21  ;;  %702 = vmatpush.msra.mxu1 %v1569_v20  ;;  %v2542_v20 = vld [vmem:[#allocation28_spill] sm:$0xff]  ;;  %v2543_v21 = vld [vmem:[#allocation29_spill] sm:$0xff] }
 0x1af   :  { %722 = vmatpush.msra.mxu2 %v1550_v14  ;;  %742 = vmatpush.msra.mxu3 %v1552_v15  ;;  %v2536_v14 = vld [vmem:[#allocation31_spill] sm:$0xff]  ;;  %v2537_v15 = vld [vmem:[#allocation30_spill] sm:$0xff] }
 0x1b0   :  { %683 = vmatpush.msra.mxu0 %v1583_v25  ;;  %703 = vmatpush.msra.mxu1 %v1581_v24  ;;  %v2544_v24 = vld [vmem:[#allocation34_spill] sm:$0xff] }
 0x1b1   :  { %723 = vmatpush.msra.mxu2 %v1562_v18  ;;  %743 = vmatpush.msra.mxu3 %v1564_v19  ;;  %v2540_v18 = vld [vmem:[#allocation33_spill] sm:$0xff]  ;;  %v2541_v19 = vld [vmem:[#allocation32_spill] sm:$0xff] }
 0x1b2   :  { %684 = vmatpush.msra.mxu0 %v1595_v29  ;;  %704 = vmatpush.msra.mxu1 %v1593_v28 }
 0x1b3   :  { %724 = vmatpush.msra.mxu2 %v1574_v22  ;;  %744 = vmatpush.msra.mxu3 %v1576_v23  ;;  %v407_v22 = vstv %s1253_s14 }
 0x1b4   :  { %685 = vmatpush.msra.mxu0 %v1607_v33  ;;  %705 = vmatpush.msra.mxu1 %v1605_v32  ;;  %v408_v25 = vmul.f32 %v407_v22, %v2544_v24  ;;  %v2020_v22 = vld [vmem:[#allocation6 + $0x1f8] sm:$0xff] }
 0x1b5   :  { %725 = vmatpush.msra.mxu2 %v1586_v26  ;;  %745 = vmatpush.msra.mxu3 %v1588_v27 }
 0x1b6   :  { %686 = vmatpush.msra.mxu0 %v1619_v37  ;;  %706 = vmatpush.msra.mxu1 %v1617_v36 }
 0x1b7   :  { %726 = vmatpush.msra.mxu2 %v1598_v30  ;;  %746 = vmatpush.msra.mxu3 %v1600_v31  ;;  %v409_v30 = vadd.f32 %v408_v25, %v1839_v62  ;;  %v2026_v25 = vld [vmem:[#allocation6 + $0x1c8] sm:$0xff] }
 0x1b8   :  { %687 = vmatpush.msra.mxu0 %v1631_v41  ;;  %707 = vmatpush.msra.mxu1 %v1629_v40 }
 0x1b9   :  { %727 = vmatpush.msra.mxu2 %v1610_v34  ;;  %747 = vmatpush.msra.mxu3 %v1612_v35 }
 0x1ba   :  { %688 = vmatpush.msra.mxu0 %v1643_v45  ;;  %708 = vmatpush.msra.mxu1 %v1641_v44 }
 0x1bb   :  { %728 = vmatpush.msra.mxu2 %v2522_v0  ;;  %748 = vmatpush.msra.mxu3 %v2523_v1 }
 0x1bc   :  { %689 = vmatpush.msra.mxu0 %v2524_v2  ;;  %709 = vmatpush.msra.mxu1 %v2525_v3 }
 0x1bd   :  { %729 = vmatpush.msra.mxu2 %v2526_v4  ;;  %749 = vmatpush.msra.mxu3 %v2527_v5  ;;  %v2008_v5 = vld [vmem:[#allocation6 + $0x1e0] sm:$0xff] }
 0x1be   :  { %690 = vmatpush.msra.mxu0 %v2528_v6  ;;  %710 = vmatpush.msra.mxu1 %v2529_v7 }
 0x1bf   :  { %730 = vmatpush.msra.mxu2 %v2530_v8  ;;  %750 = vmatpush.msra.mxu3 %v2531_v9  ;;  %v2017_v9 = vld [vmem:[#allocation6 + $0x1f0] sm:$0xff] }
 0x1c0   :  { %691 = vmatpush.msra.mxu0 %v2532_v10  ;;  %711 = vmatpush.msra.mxu1 %v2533_v11 }
 0x1c1   :  { %731 = vmatpush.msra.mxu2 %v2534_v12  ;;  %751 = vmatpush.msra.mxu3 %v2535_v13 }
 0x1c2   :  { %692 = vmatpush.msra.mxu0 %v2536_v14  ;;  %712 = vmatpush.msra.mxu1 %v2537_v15 }
 0x1c3   :  { %732 = vmatpush.msra.mxu2 %v2538_v16  ;;  %752 = vmatpush.msra.mxu3 %v2539_v17 }
 0x1c4   :  { %693 = vmatpush.msra.mxu0 %v2540_v18  ;;  %713 = vmatpush.msra.mxu1 %v2541_v19 }
 0x1c5   :  { %733 = vmatpush.msra.mxu2 %v2542_v20  ;;  %753 = vmatpush.msra.mxu3 %v2543_v21 }
 0x221   :  { %v447_v23 = vpop.f32.mrf.mxu1  ;;  %v427_v32 = vpop.f32.mrf.mxu0 }
 0x222   :  { %v494_v26 = vrot.slane %v447_v23, 7  ;;  %v2023_v23 = vld [vmem:[#allocation6 + $0x1c0] sm:$0xff] }
 0x224   :  { %v497_v33 = vsel %vm226_vm0, %v427_v32, %v494_v26  ;;  %v2029_v26 = vld [vmem:[#allocation6 + $0x1d0] sm:$0xff]  ;;  %v2050_v32 = vld [vmem:[#allocation6 + $0x188] sm:$0xff] }
 0x228   :  { %v467_v27 = vpop.f32.mrf.mxu2  ;;  %v487_v28 = vpop.f32.mrf.mxu3 }
 0x229   :  { %v495_v29 = vrot.slane %v467_v27, 6  ;;  %v496_v31 = vrot.slane %v487_v28, 5  ;;  %v2035_v27 = vld [vmem:[#allocation6 + $0x1a0] sm:$0xff]  ;;  %v2038_v28 = vld [vmem:[#allocation6 + $0x1a8] sm:$0xff] }
 0x22b   :  { %v498_v34 = vsel %vm228_vm1, %v495_v29, %v496_v31  ;;  %v2041_v29 = vld [vmem:[#allocation6 + $0x1b0] sm:$0xff]  ;;  %v2047_v31 = vld [vmem:[#allocation6 + $0x180] sm:$0xff] }
 0x22c   :  { %v499_v35 = vsel %vm230_vm2, %v497_v33, %v498_v34  ;;  %v2053_v33 = vld [vmem:[#allocation6 + $0x190] sm:$0xff]  ;;  %v2056_v34 = vld [vmem:[#allocation6 + $0x198] sm:$0xff] }
 0x22d   :  { %v501_v36 = vadd.f32 %v499_v35, %v409_v30  ;;  %v2044_v30 = vld [vmem:[#allocation6 + $0x1b8] sm:$0xff]  ;;  %v2059_v35 = vld [vmem:[#allocation6 + $0x160] sm:$0xff] }
 0x22f   :  { %v1254_v37 = vmul.f32 -1.442695, %v501_v36  ;;  %v2062_v36 = vld [vmem:[#allocation6 + $0x168] sm:$0xff] }
 0x231   :  { %1291 = vpow2.f32 %v1254_v37  ;;  %v2065_v37 = vld [vmem:[#allocation6 + $0x170] sm:$0xff] }
 0x237   :  { %v1292_v40 = vpop.eup %1291 }
 0x238   :  { %v505_v41 = vadd.f32 1.0, %v1292_v40  ;;  %v2068_v40 = vld [vmem:[#allocation6 + $0x178] sm:$0xff] }
 0x23a   :  { %1293 = vrcp.f32 %v505_v41  ;;  %v517_v60 = vand.u32 2147483648, %v505_v41  ;;  %v515_v57 = vand.u32 2147483647, %v505_v41  ;;  %vm511_vm14 = vweird.f32 %v505_v41 }
 0x23c   :  { %v518_v49 = vor.u32 1.1754944e-38, %v517_v60  ;;  %vm516_vm3 = vcmp.eq.f32.partialorder %v515_v57, 8.507059e+37  ;;  %v2083_v60 = vld [vmem:[#allocation6 + $0x120] sm:$0xff]  ;;  %v2089_v57 = vld [vmem:[#allocation6 + $0x130] sm:$0xff] }
 0x240   :  { %v1294_v61 = vpop.eup %1293 }
 0x241   :  { %v507_v53 = vmul.f32 %v1294_v61, %v505_v41  ;;  %vm512_vm13 = vweird.f32 %v1294_v61  ;;  %v2071_v41 = vld [vmem:[#allocation6 + $0x140] sm:$0xff] }
 0x242   :  { %vm513_vm15 = vmor %vm511_vm14, %vm512_vm13  ;;  %vm803_vm14 = vcmp.eq.s32.totalorder %v1927_v52, 4 }
 0x243   :  { %v508_v55 = vsub.f32 1.0, %v507_v53  ;;  %v2077_v53 = vld [vmem:[#allocation6 + $0x150] sm:$0xff] }
 0x245   :  { %v509_v54 = vmul.f32 %v1294_v61, %v508_v55  ;;  %v2080_v55 = vld [vmem:[#allocation6 + $0x158] sm:$0xff] }
 0x247   :  { %v510_v46 = vadd.f32 %v1294_v61, %v509_v54  ;;  %v2086_v54 = vld [vmem:[#allocation6 + $0x128] sm:$0xff] }
 0x249   :  { %v514_v58 = vsel %vm513_vm15, %v1294_v61, %v510_v46  ;;  %v2074_v61 = vld [vmem:[#allocation6 + $0x148] sm:$0xff]  ;;  %v2092_v46 = vld [vmem:[#allocation6 + $0x138] sm:$0xff] }
 0x24a   :  { %v519_v43 = vsel %vm516_vm3, %v518_v49, %v514_v58  ;;  %v2095_v49 = vld [vmem:[#allocation6 + $0x100] sm:$0xff]  ;;  %v2098_v58 = vld [vmem:[#allocation6 + $0x108] sm:$0xff] }
 0x24b   :  { %v522_v59 = vrot.slane %v519_v43, 2  ;;  %v526_v38 = vrot.slane %v519_v43, 1  ;;  %v532_v56 = vrot.slane %v519_v43, 3 }
 0x24d   :  { %v524_v48 = vmul.f32 2.0, %v522_v59  ;;  %v528_v47 = vmul.f32 %v526_v38, %v1924_v42  ;;  %v2011_v42 = vld [vmem:[#allocation6 + $0x1e8] sm:$0xff]  ;;  %v2104_v59 = vld [vmem:[#allocation6 + $0x118] sm:$0xff] }
 0x24e   :  { %v2110_v38 = vld [vmem:[#allocation6 + $0xe8] sm:$0xff] }
 0x24f   :  { %v1255_v39 = vadd.f32 -1.0, %v524_v48  ;;  %v2107_v48 = vld [vmem:[#allocation6 + $0xe0] sm:$0xff] }
 0x251   :  { %v529_v51 = vmul.f32 %v1255_v39, %v519_v43  ;;  %v2101_v43 = vld [vmem:[#allocation6 + $0x110] sm:$0xff] }
 0x252   :  { %v2113_v39 = vld [vmem:[#allocation6 + $0xf0] sm:$0xff] }
 0x253   :  { %v2004_v63 = vadd.f32 %v529_v51, %v528_v47  ;;  %v2116_v47 = vld [vmem:[#allocation6 + $0xf8] sm:$0xff]  ;;  %v2119_v51 = vld [vmem:[#allocation6 + $0xc0] sm:$0xff] }
 0x254   :  { %2545 = vst [vmem:[#allocation12_spill] sm:$0xff] %v2119_v51 }
 0x255   :  { %1295 = vtanh.f32 %v2004_v63 }
 0x25b   :  { %v1296_v0 = vpop.eup %1295 }
 0x25c   :  { %v534_v1 = vmul.f32 %v1296_v0, %v532_v56  ;;  %v2122_v56 = vld [vmem:[#allocation6 + $0xc8] sm:$0xff]  ;;  %v2125_v0 = vld [vmem:[#allocation6 + $0xd0] sm:$0xff] }
 0x25d   :  { %2546 = vst [vmem:[#allocation13_spill] sm:$0xff] %v2125_v0 }
 0x25e   :  { %560 = vmatmul.f32.vlgmr.msrb.gmra.mxu0 %v534_v1  ;;  %580 = vmatmul.f32.vlgmr.msrb.gmra.mxu1 %v534_v1  ;;  %v537_v4 = vperm.slane %v534_v1, 0 }
 0x25f   :  { %600 = vmatmul.f32.vlgmr.msrb.gmra.mxu2 %v534_v1  ;;  %620 = vmatmul.f32.vlgmr.msrb.gmra.mxu3 %v534_v1  ;;  %v2128_v1 = vld [vmem:[#allocation6 + $0xd8] sm:$0xff] }
 0x260   :  { %812 = vmatpush.msrb.mxu0 %v2008_v5  ;;  %832 = vmatpush.msrb.mxu1 %v2011_v42  ;;  %v2015_v8 = vsel %vm535_vm4, %v537_v4, %v1934_v50  ;;  %v2032_v50 = vld [vmem:[#allocation6 + $0x1d8] sm:$0xff]  ;;  %2547 = vst [vmem:[#allocation19_spill] sm:$0xff] %v2128_v1  ;;  %v2133_v4 = vld [vmem:[#allocation6 + $0xb0] sm:$0xff] }
 0x261   :  { %852 = vmatpush.msrb.mxu2 %v2017_v9  ;;  %872 = vmatpush.msrb.mxu3 %v2020_v22  ;;  %2548 = vst [vmem:[#allocation18_spill] sm:$0xff] %v2133_v4 }
 0x262   :  { %813 = vmatpush.msrb.mxu0 %v2023_v23  ;;  %833 = vmatpush.msrb.mxu1 %v2026_v25 }
 0x263   :  { %853 = vmatpush.msrb.mxu2 %v2029_v26  ;;  %873 = vmatpush.msrb.mxu3 %v2032_v50 }
 0x264   :  { %814 = vmatpush.msrb.mxu0 %v2035_v27  ;;  %834 = vmatpush.msrb.mxu1 %v2038_v28 }
 0x265   :  { %854 = vmatpush.msrb.mxu2 %v2041_v29  ;;  %874 = vmatpush.msrb.mxu3 %v2044_v30 }
 0x266   :  { %815 = vmatpush.msrb.mxu0 %v2047_v31  ;;  %835 = vmatpush.msrb.mxu1 %v2050_v32 }
 0x267   :  { %855 = vmatpush.msrb.mxu2 %v2053_v33  ;;  %875 = vmatpush.msrb.mxu3 %v2056_v34 }
 0x268   :  { %816 = vmatpush.msrb.mxu0 %v2059_v35  ;;  %836 = vmatpush.msrb.mxu1 %v2062_v36 }
 0x269   :  { %856 = vmatpush.msrb.mxu2 %v2065_v37  ;;  %876 = vmatpush.msrb.mxu3 %v2068_v40 }
 0x26a   :  { %817 = vmatpush.msrb.mxu0 %v2071_v41  ;;  %837 = vmatpush.msrb.mxu1 %v2074_v61 }
 0x26b   :  { %857 = vmatpush.msrb.mxu2 %v2077_v53  ;;  %877 = vmatpush.msrb.mxu3 %v2080_v55 }
 0x26c   :  { %818 = vmatpush.msrb.mxu0 %v2083_v60  ;;  %838 = vmatpush.msrb.mxu1 %v2086_v54 }
 0x26d   :  { %858 = vmatpush.msrb.mxu2 %v2089_v57  ;;  %878 = vmatpush.msrb.mxu3 %v2092_v46 }
 0x26e   :  { %819 = vmatpush.msrb.mxu0 %v2095_v49  ;;  %839 = vmatpush.msrb.mxu1 %v2098_v58 }
 0x26f   :  { %859 = vmatpush.msrb.mxu2 %v2101_v43  ;;  %879 = vmatpush.msrb.mxu3 %v2104_v59 }
 0x270   :  { %820 = vmatpush.msrb.mxu0 %v2107_v48  ;;  %840 = vmatpush.msrb.mxu1 %v2110_v38 }
 0x271   :  { %860 = vmatpush.msrb.mxu2 %v2113_v39  ;;  %880 = vmatpush.msrb.mxu3 %v2116_v47 }
 0x272   :  { %821 = vmatpush.msrb.mxu0 %v2119_v51  ;;  %841 = vmatpush.msrb.mxu1 %v2122_v56  ;;  %v2136_v51 = vld [vmem:[#allocation6 + $0xb8] sm:$0xff] }
 0x273   :  { %861 = vmatpush.msrb.mxu2 %v2125_v0  ;;  %881 = vmatpush.msrb.mxu3 %v2128_v1  ;;  %2549 = vst [vmem:[#allocation14_spill] sm:$0xff] %v2136_v51  ;;  %v2141_v0 = vld [vmem:[#allocation6 + $0x90] sm:$0xff]  ;;  %v2144_v1 = vld [vmem:[#allocation6 + $0x98] sm:$0xff] }
 0x274   :  { %822 = vmatpush.msrb.mxu0 %v1643_v45  ;;  %842 = vmatpush.msrb.mxu1 %v1641_v44  ;;  %2550 = vst [vmem:[#allocation15_spill] sm:$0xff] %v2141_v0  ;;  %v2149_v44 = vld [vmem:[#allocation6 + $0x70] sm:$0xff]  ;;  %v2152_v45 = vld [vmem:[#allocation6 + $0x78] sm:$0xff] }
 0x275   :  { %862 = vmatpush.msrb.mxu2 %v2133_v4  ;;  %882 = vmatpush.msrb.mxu3 %v2136_v51  ;;  %2551 = vst [vmem:[#allocation23_spill] sm:$0xff] %v2144_v1 }
 0x276   :  { %823 = vmatpush.msrb.mxu0 %v2524_v2  ;;  %843 = vmatpush.msrb.mxu1 %v2525_v3  ;;  %2552 = vst [vmem:[#allocation22_spill] sm:$0xff] %v2149_v44  ;;  %v541_v2 = vstv %s1256_s15 }
 0x277   :  { %863 = vmatpush.msrb.mxu2 %v2141_v0  ;;  %883 = vmatpush.msrb.mxu3 %v2144_v1  ;;  %2553 = vst [vmem:[#allocation16_spill] sm:$0xff] %v2152_v45 }
 0x278   :  { %824 = vmatpush.msrb.mxu0 %v2528_v6  ;;  %844 = vmatpush.msrb.mxu1 %v2529_v7  ;;  %v542_v6 = vmul.f32 %v541_v2, %v2544_v24 }
 0x279   :  { %864 = vmatpush.msrb.mxu2 %v2149_v44  ;;  %884 = vmatpush.msrb.mxu3 %v2152_v45 }
 0x27a   :  { %825 = vmatpush.msrb.mxu0 %v2532_v10  ;;  %845 = vmatpush.msrb.mxu1 %v2533_v11 }
 0x27b   :  { %865 = vmatpush.msrb.mxu2 %v2534_v12  ;;  %885 = vmatpush.msrb.mxu3 %v2535_v13  ;;  %v543_v13 = vadd.f32 %v542_v6, %v1839_v62 }
 0x27c   :  { %826 = vmatpush.msrb.mxu0 %v2536_v14  ;;  %846 = vmatpush.msrb.mxu1 %v2537_v15 }
 0x27d   :  { %866 = vmatpush.msrb.mxu2 %v2538_v16  ;;  %886 = vmatpush.msrb.mxu3 %v2539_v17 }
 0x27e   :  { %827 = vmatpush.msrb.mxu0 %v2540_v18  ;;  %847 = vmatpush.msrb.mxu1 %v2541_v19 }
 0x27f   :  { %867 = vmatpush.msrb.mxu2 %v2542_v20  ;;  %887 = vmatpush.msrb.mxu3 %v2543_v21 }
 0x2db   :  { %v581_v3 = vpop.f32.mrf.mxu1  ;;  %v561_v15 = vpop.f32.mrf.mxu0 }
 0x2dc   :  { %v628_v7 = vrot.slane %v581_v3, 7 }
 0x2de   :  { %v631_v16 = vsel %vm226_vm0, %v561_v15, %v628_v7 }
 0x2e2   :  { %v601_v10 = vpop.f32.mrf.mxu2  ;;  %v621_v11 = vpop.f32.mrf.mxu3 }
 0x2e3   :  { %v629_v12 = vrot.slane %v601_v10, 6  ;;  %v630_v14 = vrot.slane %v621_v11, 5 }
 0x2e5   :  { %v632_v17 = vsel %vm228_vm1, %v629_v12, %v630_v14 }
 0x2e6   :  { %v633_v18 = vsel %vm230_vm2, %v631_v16, %v632_v17 }
 0x2e7   :  { %v635_v19 = vadd.f32 %v633_v18, %v543_v13 }
 0x2e9   :  { %v1257_v20 = vmul.f32 -1.442695, %v635_v19 }
 0x2eb   :  { %1297 = vpow2.f32 %v1257_v20 }
 0x2f1   :  { %v1298_v21 = vpop.eup %1297 }
 0x2f2   :  { %v639_v45 = vadd.f32 1.0, %v1298_v21 }
 0x2f4   :  { %1299 = vrcp.f32 %v639_v45  ;;  %v651_v10 = vand.u32 2147483648, %v639_v45  ;;  %v649_v6 = vand.u32 2147483647, %v639_v45  ;;  %vm645_vm6 = vweird.f32 %v639_v45 }
 0x2f6   :  { %v652_v7 = vor.u32 1.1754944e-38, %v651_v10  ;;  %vm650_vm8 = vcmp.eq.f32.partialorder %v649_v6, 8.507059e+37  ;;  %v2220_v10 = vld [vmem:[#allocation6 + $0xa0] sm:$0xff]  ;;  %v2223_v6 = vld [vmem:[#allocation6 + $0xa8] sm:$0xff] }
 0x2f7   :  { %2557 = vst [vmem:[#allocation17_spill] sm:$0xff] %v2223_v6 }
 0x2fa   :  { %v1300_v2 = vpop.eup %1299 }
 0x2fb   :  { %v641_v3 = vmul.f32 %v1300_v2, %v639_v45  ;;  %vm646_vm5 = vweird.f32 %v1300_v2 }
 0x2fc   :  { %vm647_vm7 = vmor %vm645_vm6, %vm646_vm5  ;;  %vm937_vm6 = vcmp.eq.s32.totalorder %v1927_v52, 5 }
 0x2fd   :  { %v642_v24 = vsub.f32 1.0, %v641_v3  ;;  %v2556_v3 = vld [vmem:[#allocation19_spill] sm:$0xff] }
 0x2ff   :  { %v643_v44 = vmul.f32 %v1300_v2, %v642_v24 }
 0x301   :  { %v644_v11 = vadd.f32 %v1300_v2, %v643_v44 }
 0x303   :  { %v648_v12 = vsel %vm647_vm7, %v1300_v2, %v644_v11  ;;  %v2555_v2 = vld [vmem:[#allocation13_spill] sm:$0xff]  ;;  %v2228_v11 = vld [vmem:[#allocation6 + $0x80] sm:$0xff] }
 0x304   :  { %v653_v14 = vsel %vm650_vm8, %v652_v7, %v648_v12  ;;  %2558 = vst [vmem:[#allocation27_spill] sm:$0xff] %v2228_v11  ;;  %v2231_v7 = vld [vmem:[#allocation6 + $0x88] sm:$0xff]  ;;  %v2236_v12 = vld [vmem:[#allocation6 + $0x60] sm:$0xff] }
 0x305   :  { %v656_v13 = vrot.slane %v653_v14, 2  ;;  %v660_v16 = vrot.slane %v653_v14, 1  ;;  %v666_v24 = vrot.slane %v653_v14, 3  ;;  %2559 = vst [vmem:[#allocation26_spill] sm:$0xff] %v2231_v7 }
 0x306   :  { %2560 = vst [vmem:[#allocation20_spill] sm:$0xff] %v2236_v12 }
 0x307   :  { %v658_v15 = vmul.f32 2.0, %v656_v13  ;;  %v662_v18 = vmul.f32 %v660_v16, %v2004_v63  ;;  %v2562_v13 = vld [vmem:[#allocation22_spill] sm:$0xff]  ;;  %v2244_v16 = vld [vmem:[#allocation6 + $0x40] sm:$0xff] }
 0x308   :  { %2564 = vst [vmem:[#allocation31_spill] sm:$0xff] %v2244_v16 }
 0x309   :  { %v1258_v17 = vadd.f32 -1.0, %v658_v15  ;;  %v2563_v15 = vld [vmem:[#allocation16_spill] sm:$0xff] }
 0x30b   :  { %v663_v19 = vmul.f32 %v1258_v17, %v653_v14  ;;  %v2239_v14 = vld [vmem:[#allocation6 + $0x68] sm:$0xff] }
 0x30c   :  { %2561 = vst [vmem:[#allocation21_spill] sm:$0xff] %v2239_v14  ;;  %v2247_v17 = vld [vmem:[#allocation6 + $0x48] sm:$0xff] }
 0x30d   :  { %v2173_v20 = vadd.f32 %v663_v19, %v662_v18  ;;  %2565 = vst [vmem:[#allocation30_spill] sm:$0xff] %v2247_v17  ;;  %v2250_v18 = vld [vmem:[#allocation6 + $0x50] sm:$0xff]  ;;  %v2253_v19 = vld [vmem:[#allocation6 + $0x58] sm:$0xff] }
 0x30e   :  { %2566 = vst [vmem:[#allocation24_spill] sm:$0xff] %v2250_v18 }
 0x30f   :  { %1301 = vtanh.f32 %v2173_v20  ;;  %2567 = vst [vmem:[#allocation25_spill] sm:$0xff] %v2253_v19 }
 0x315   :  { %v1302_v21 = vpop.eup %1301 }
 0x316   :  { %v668_v44 = vmul.f32 %v1302_v21, %v666_v24  ;;  %v2256_v24 = vld [vmem:[#allocation6 + $0x20] sm:$0xff]  ;;  %v2259_v21 = vld [vmem:[#allocation6 + $0x28] sm:$0xff] }
 0x317   :  { %2568 = vst [vmem:[#allocation33_spill] sm:$0xff] %v2256_v24 }
 0x318   :  { %694 = vmatmul.f32.vlgmr.msra.gmra.mxu0 %v668_v44  ;;  %714 = vmatmul.f32.vlgmr.msra.gmra.mxu1 %v668_v44  ;;  %v671_v45 = vperm.slane %v668_v44, 0  ;;  %2569 = vst [vmem:[#allocation32_spill] sm:$0xff] %v2259_v21 }
 0x319   :  { %734 = vmatmul.f32.vlgmr.msra.gmra.mxu2 %v668_v44  ;;  %754 = vmatmul.f32.vlgmr.msra.gmra.mxu3 %v668_v44  ;;  %v2262_v44 = vld [vmem:[#allocation6 + $0x30] sm:$0xff] }
 0x31a   :  { %946 = vmatpush.msra.mxu0 %v2008_v5  ;;  %966 = vmatpush.msra.mxu1 %v2011_v42  ;;  %v2180_v63 = vsel %vm669_vm9, %v671_v45, %v2015_v8  ;;  %v2554_v8 = vld [vmem:[#allocation12_spill] sm:$0xff]  ;;  %2570 = vst [vmem:[#allocation28_spill] sm:$0xff] %v2262_v44  ;;  %v2265_v45 = vld [vmem:[#allocation6 + $0x38] sm:$0xff] }
 0x31b   :  { %986 = vmatpush.msra.mxu2 %v2017_v9  ;;  %1006 = vmatpush.msra.mxu3 %v2020_v22  ;;  %2571 = vst [vmem:[#allocation29_spill] sm:$0xff] %v2265_v45 }
 0x31c   :  { %947 = vmatpush.msra.mxu0 %v2023_v23  ;;  %967 = vmatpush.msra.mxu1 %v2026_v25 }
 0x31d   :  { %987 = vmatpush.msra.mxu2 %v2029_v26  ;;  %1007 = vmatpush.msra.mxu3 %v2032_v50 }
 0x31e   :  { %948 = vmatpush.msra.mxu0 %v2035_v27  ;;  %968 = vmatpush.msra.mxu1 %v2038_v28 }
 0x31f   :  { %988 = vmatpush.msra.mxu2 %v2041_v29  ;;  %1008 = vmatpush.msra.mxu3 %v2044_v30 }
 0x320   :  { %949 = vmatpush.msra.mxu0 %v2047_v31  ;;  %969 = vmatpush.msra.mxu1 %v2050_v32 }
 0x321   :  { %989 = vmatpush.msra.mxu2 %v2053_v33  ;;  %1009 = vmatpush.msra.mxu3 %v2056_v34 }
 0x322   :  { %950 = vmatpush.msra.mxu0 %v2059_v35  ;;  %970 = vmatpush.msra.mxu1 %v2062_v36 }
 0x323   :  { %990 = vmatpush.msra.mxu2 %v2065_v37  ;;  %1010 = vmatpush.msra.mxu3 %v2068_v40 }
 0x324   :  { %951 = vmatpush.msra.mxu0 %v2071_v41  ;;  %971 = vmatpush.msra.mxu1 %v2074_v61 }
 0x325   :  { %991 = vmatpush.msra.mxu2 %v2077_v53  ;;  %1011 = vmatpush.msra.mxu3 %v2080_v55 }
 0x326   :  { %952 = vmatpush.msra.mxu0 %v2083_v60  ;;  %972 = vmatpush.msra.mxu1 %v2086_v54 }
 0x327   :  { %992 = vmatpush.msra.mxu2 %v2089_v57  ;;  %1012 = vmatpush.msra.mxu3 %v2092_v46 }
 0x328   :  { %953 = vmatpush.msra.mxu0 %v2095_v49  ;;  %973 = vmatpush.msra.mxu1 %v2098_v58 }
 0x329   :  { %993 = vmatpush.msra.mxu2 %v2101_v43  ;;  %1013 = vmatpush.msra.mxu3 %v2104_v59 }
 0x32a   :  { %954 = vmatpush.msra.mxu0 %v2107_v48  ;;  %974 = vmatpush.msra.mxu1 %v2110_v38 }
 0x32b   :  { %994 = vmatpush.msra.mxu2 %v2113_v39  ;;  %1014 = vmatpush.msra.mxu3 %v2116_v47 }
 0x32c   :  { %955 = vmatpush.msra.mxu0 %v2554_v8  ;;  %975 = vmatpush.msra.mxu1 %v2122_v56 }
 0x32d   :  { %995 = vmatpush.msra.mxu2 %v2555_v2  ;;  %1015 = vmatpush.msra.mxu3 %v2556_v3 }
 0x32e   :  { %956 = vmatpush.msra.mxu0 %v2220_v10  ;;  %976 = vmatpush.msra.mxu1 %v2223_v6 }
 0x32f   :  { %996 = vmatpush.msra.mxu2 %v2133_v4  ;;  %1016 = vmatpush.msra.mxu3 %v2136_v51 }
 0x330   :  { %957 = vmatpush.msra.mxu0 %v2228_v11  ;;  %977 = vmatpush.msra.mxu1 %v2231_v7 }
 0x331   :  { %997 = vmatpush.msra.mxu2 %v2141_v0  ;;  %1017 = vmatpush.msra.mxu3 %v2144_v1 }
 0x332   :  { %958 = vmatpush.msra.mxu0 %v2236_v12  ;;  %978 = vmatpush.msra.mxu1 %v2239_v14 }
 0x333   :  { %998 = vmatpush.msra.mxu2 %v2562_v13  ;;  %1018 = vmatpush.msra.mxu3 %v2563_v15 }
 0x334   :  { %959 = vmatpush.msra.mxu0 %v2244_v16  ;;  %979 = vmatpush.msra.mxu1 %v2247_v17 }
 0x335   :  { %999 = vmatpush.msra.mxu2 %v2250_v18  ;;  %1019 = vmatpush.msra.mxu3 %v2253_v19  ;;  %v2268_v18 = vld [vmem:[#allocation6] sm:$0xff]  ;;  %v2271_v19 = vld [vmem:[#allocation6 + $0x8] sm:$0xff] }
 0x336   :  { %960 = vmatpush.msra.mxu0 %v2256_v24  ;;  %980 = vmatpush.msra.mxu1 %v2259_v21  ;;  %2572 = vst [vmem:[#allocation12_spill] sm:$0xff] %v2268_v18  ;;  %v2274_v24 = vld [vmem:[#allocation6 + $0x10] sm:$0xff]  ;;  %v2277_v21 = vld [vmem:[#allocation6 + $0x18] sm:$0xff] }
 0x337   :  { %1000 = vmatpush.msra.mxu2 %v2262_v44  ;;  %1020 = vmatpush.msra.mxu3 %v2265_v45  ;;  %2573 = vst [vmem:[#allocation13_spill] sm:$0xff] %v2271_v19  ;;  %v675_v44 = vstv %s1259_s16  ;;  %v2576_v45 = vld [vmem:[#allocation34_spill] sm:$0xff] }
 0x338   :  { %961 = vmatpush.msra.mxu0 %v2268_v18  ;;  %981 = vmatpush.msra.mxu1 %v2271_v19  ;;  %2574 = vst [vmem:[#allocation19_spill] sm:$0xff] %v2274_v24  ;;  %v676_v16 = vmul.f32 %v675_v44, %v2576_v45 }
 0x339   :  { %1001 = vmatpush.msra.mxu2 %v2274_v24  ;;  %2575 = vst [vmem:[#allocation35_spill] sm:$0xff] %v2277_v21  ;;  %1021 = vmatpush.msra.mxu3 %v2277_v21 }
 0x33a   :  { %v677_v12 = vadd.f32 %v676_v16, %v1839_v62 }
 0x395   :  { %v715_v17 = vpop.f32.mrf.mxu1  ;;  %v695_v1 = vpop.f32.mrf.mxu0 }
 0x396   :  { %v762_v15 = vrot.slane %v715_v17, 7 }
 0x398   :  { %v765_v0 = vsel %vm226_vm0, %v695_v1, %v762_v15 }
 0x39c   :  { %v735_v13 = vpop.f32.mrf.mxu2  ;;  %v755_v18 = vpop.f32.mrf.mxu3 }
 0x39d   :  { %v763_v14 = vrot.slane %v735_v13, 6  ;;  %v764_v19 = vrot.slane %v755_v18, 5 }
 0x39f   :  { %v766_v24 = vsel %vm228_vm1, %v763_v14, %v764_v19 }
 0x3a0   :  { %v767_v7 = vsel %vm230_vm2, %v765_v0, %v766_v24 }
 0x3a1   :  { %v769_v21 = vadd.f32 %v767_v7, %v677_v12 }
 0x3a3   :  { %v1260_v11 = vmul.f32 -1.442695, %v769_v21 }
 0x3a5   :  { %1303 = vpow2.f32 %v1260_v11 }
 0x3ab   :  { %v1304_v51 = vpop.eup %1303 }
 0x3ac   :  { %v773_v4 = vadd.f32 1.0, %v1304_v51 }
 0x3ae   :  { %1305 = vrcp.f32 %v773_v4  ;;  %v785_v13 = vand.u32 2147483648, %v773_v4  ;;  %v783_v62 = vand.u32 2147483647, %v773_v4  ;;  %vm779_vm11 = vweird.f32 %v773_v4 }
 0x3b0   :  { %v786_v1 = vor.u32 1.1754944e-38, %v785_v13  ;;  %vm784_vm13 = vcmp.eq.f32.partialorder %v783_v62, 8.507059e+37 }
 0x3b4   :  { %v1306_v17 = vpop.eup %1305 }
 0x3b5   :  { %v775_v44 = vmul.f32 %v1306_v17, %v773_v4  ;;  %vm780_vm10 = vweird.f32 %v1306_v17 }
 0x3b6   :  { %vm781_vm12 = vmor %vm779_vm11, %vm780_vm10  ;;  %vm1071_vm11 = vcmp.eq.s32.totalorder %v1927_v52, 6 }
 0x3b7   :  { %v776_v45 = vsub.f32 1.0, %v775_v44 }
 0x3b9   :  { %v777_v6 = vmul.f32 %v1306_v17, %v776_v45 }
 0x3bb   :  { %v778_v16 = vadd.f32 %v1306_v17, %v777_v6 }
 0x3bd   :  { %v782_v14 = vsel %vm781_vm12, %v1306_v17, %v778_v16 }
 0x3be   :  { %v787_v0 = vsel %vm784_vm13, %v786_v1, %v782_v14 }
 0x3bf   :  { %v790_v7 = vrot.slane %v787_v0, 2  ;;  %v794_v11 = vrot.slane %v787_v0, 1  ;;  %v800_v24 = vrot.slane %v787_v0, 3 }
 0x3c1   :  { %v792_v12 = vmul.f32 2.0, %v790_v7  ;;  %v796_v51 = vmul.f32 %v794_v11, %v2173_v20 }
 0x3c3   :  { %v1261_v15 = vadd.f32 -1.0, %v792_v12 }
 0x3c5   :  { %v797_v18 = vmul.f32 %v1261_v15, %v787_v0 }
 0x3c7   :  { %v2286_v19 = vadd.f32 %v797_v18, %v796_v51 }
 0x3c9   :  { %1307 = vtanh.f32 %v2286_v19 }
 0x3cf   :  { %v1308_v21 = vpop.eup %1307 }
 0x3d0   :  { %v802_v6 = vmul.f32 %v1308_v21, %v800_v24 }
 0x3d2   :  { %828 = vmatmul.f32.vlgmr.msrb.gmra.mxu0 %v802_v6  ;;  %848 = vmatmul.f32.vlgmr.msrb.gmra.mxu1 %v802_v6  ;;  %v805_v4 = vperm.slane %v802_v6, 0 }
 0x3d3   :  { %868 = vmatmul.f32.vlgmr.msrb.gmra.mxu2 %v802_v6  ;;  %888 = vmatmul.f32.vlgmr.msrb.gmra.mxu3 %v802_v6 }
 0x3d4   :  { %1080 = vmatpush.msrb.mxu0 %v2008_v5  ;;  %1100 = vmatpush.msrb.mxu1 %v2011_v42  ;;  %v2293_v20 = vsel %vm803_vm14, %v805_v4, %v2180_v63  ;;  %v2577_v5 = vld [vmem:[#allocation17_spill] sm:$0xff]  ;;  %v2578_v42 = vld [vmem:[#allocation18_spill] sm:$0xff] }
 0x3d5   :  { %1120 = vmatpush.msrb.mxu2 %v2017_v9  ;;  %1140 = vmatpush.msrb.mxu3 %v2020_v22  ;;  %v2579_v9 = vld [vmem:[#allocation14_spill] sm:$0xff]  ;;  %v2580_v22 = vld [vmem:[#allocation27_spill] sm:$0xff] }
 0x3d6   :  { %1081 = vmatpush.msrb.mxu0 %v2023_v23  ;;  %1101 = vmatpush.msrb.mxu1 %v2026_v25  ;;  %v2581_v23 = vld [vmem:[#allocation26_spill] sm:$0xff]  ;;  %v2582_v25 = vld [vmem:[#allocation15_spill] sm:$0xff] }
 0x3d7   :  { %1121 = vmatpush.msrb.mxu2 %v2029_v26  ;;  %1141 = vmatpush.msrb.mxu3 %v2032_v50  ;;  %v2583_v26 = vld [vmem:[#allocation23_spill] sm:$0xff]  ;;  %v2584_v50 = vld [vmem:[#allocation20_spill] sm:$0xff] }
 0x3d8   :  { %1082 = vmatpush.msrb.mxu0 %v2035_v27  ;;  %1102 = vmatpush.msrb.mxu1 %v2038_v28  ;;  %v2585_v27 = vld [vmem:[#allocation21_spill] sm:$0xff]  ;;  %v2586_v28 = vld [vmem:[#allocation22_spill] sm:$0xff] }
 0x3d9   :  { %1122 = vmatpush.msrb.mxu2 %v2041_v29  ;;  %1142 = vmatpush.msrb.mxu3 %v2044_v30  ;;  %v2587_v29 = vld [vmem:[#allocation16_spill] sm:$0xff]  ;;  %v2588_v30 = vld [vmem:[#allocation31_spill] sm:$0xff] }
 0x3da   :  { %1083 = vmatpush.msrb.mxu0 %v2047_v31  ;;  %1103 = vmatpush.msrb.mxu1 %v2050_v32  ;;  %v2589_v31 = vld [vmem:[#allocation30_spill] sm:$0xff]  ;;  %v2590_v32 = vld [vmem:[#allocation24_spill] sm:$0xff] }
 0x3db   :  { %1123 = vmatpush.msrb.mxu2 %v2053_v33  ;;  %1143 = vmatpush.msrb.mxu3 %v2056_v34  ;;  %v2591_v33 = vld [vmem:[#allocation25_spill] sm:$0xff] }
 0x3dc   :  { %1084 = vmatpush.msrb.mxu0 %v2059_v35  ;;  %1104 = vmatpush.msrb.mxu1 %v2062_v36  ;;  %v2592_v34 = vld [vmem:[#allocation33_spill] sm:$0xff]  ;;  %v2593_v35 = vld [vmem:[#allocation32_spill] sm:$0xff] }
 0x3dd   :  { %1124 = vmatpush.msrb.mxu2 %v2065_v37  ;;  %1144 = vmatpush.msrb.mxu3 %v2068_v40  ;;  %v2594_v36 = vld [vmem:[#allocation28_spill] sm:$0xff]  ;;  %v2595_v37 = vld [vmem:[#allocation29_spill] sm:$0xff] }
 0x3de   :  { %1085 = vmatpush.msrb.mxu0 %v2071_v41  ;;  %1105 = vmatpush.msrb.mxu1 %v2074_v61  ;;  %v2596_v40 = vld [vmem:[#allocation12_spill] sm:$0xff]  ;;  %v2597_v41 = vld [vmem:[#allocation13_spill] sm:$0xff]  ;;  %v2598_v61 = vld [vmem:[#allocation19_spill] sm:$0xff] }
 0x3df   :  { %1125 = vmatpush.msrb.mxu2 %v2077_v53  ;;  %1145 = vmatpush.msrb.mxu3 %v2080_v55  ;;  %v2599_v53 = vld [vmem:[#allocation35_spill] sm:$0xff]  ;;  %v809_v55 = vstv %s1262_s17 }
 0x3e0   :  { %1086 = vmatpush.msrb.mxu0 %v2083_v60  ;;  %1106 = vmatpush.msrb.mxu1 %v2086_v54  ;;  %v2360_v54 = vld [vmem:[%s2394_s1] sm:$0xf]  ;;  %s1265_s1 = sld [smem:[#allocation3 + $0x6]] }
 0x3e1   :  { %1126 = vmatpush.msrb.mxu2 %v2089_v57  ;;  %1146 = vmatpush.msrb.mxu3 %v2092_v46  ;;  %v810_v57 = vmul.f32 %v2360_v54, %v809_v55 }
 0x3e2   :  { %1087 = vmatpush.msrb.mxu0 %v2095_v49  ;;  %1107 = vmatpush.msrb.mxu1 %v2098_v58 }
 0x3e3   :  { %1127 = vmatpush.msrb.mxu2 %v2101_v43  ;;  %1147 = vmatpush.msrb.mxu3 %v2104_v59  ;;  %v2363_v59 = vld [vmem:[#allocation7] sm:$0xf] }
 0x3e4   :  { %1088 = vmatpush.msrb.mxu0 %v2107_v48  ;;  %1108 = vmatpush.msrb.mxu1 %v2110_v38  ;;  %v811_v48 = vadd.f32 %v2363_v59, %v810_v57 }
 0x3e5   :  { %1128 = vmatpush.msrb.mxu2 %v2113_v39  ;;  %1148 = vmatpush.msrb.mxu3 %v2116_v47 }
 0x3e6   :  { %1089 = vmatpush.msrb.mxu0 %v2554_v8  ;;  %1109 = vmatpush.msrb.mxu1 %v2122_v56 }
 0x3e7   :  { %1129 = vmatpush.msrb.mxu2 %v2555_v2  ;;  %1149 = vmatpush.msrb.mxu3 %v2556_v3 }
 0x3e8   :  { %1090 = vmatpush.msrb.mxu0 %v2220_v10  ;;  %1110 = vmatpush.msrb.mxu1 %v2577_v5 }
 0x3e9   :  { %1130 = vmatpush.msrb.mxu2 %v2578_v42  ;;  %1150 = vmatpush.msrb.mxu3 %v2579_v9 }
 0x3ea   :  { %1091 = vmatpush.msrb.mxu0 %v2580_v22  ;;  %1111 = vmatpush.msrb.mxu1 %v2581_v23  ;;  %v943_v22 = vstv %s1265_s1 }
 0x3eb   :  { %1131 = vmatpush.msrb.mxu2 %v2582_v25  ;;  %1151 = vmatpush.msrb.mxu3 %v2583_v26 }
 0x3ec   :  { %1092 = vmatpush.msrb.mxu0 %v2584_v50  ;;  %1112 = vmatpush.msrb.mxu1 %v2585_v27 }
 0x3ed   :  { %1132 = vmatpush.msrb.mxu2 %v2586_v28  ;;  %1152 = vmatpush.msrb.mxu3 %v2587_v29 }
 0x3ee   :  { %1093 = vmatpush.msrb.mxu0 %v2588_v30  ;;  %1113 = vmatpush.msrb.mxu1 %v2589_v31 }
 0x3ef   :  { %1133 = vmatpush.msrb.mxu2 %v2590_v32  ;;  %1153 = vmatpush.msrb.mxu3 %v2591_v33 }
 0x3f0   :  { %1094 = vmatpush.msrb.mxu0 %v2592_v34  ;;  %1114 = vmatpush.msrb.mxu1 %v2593_v35 }
 0x3f1   :  { %1134 = vmatpush.msrb.mxu2 %v2594_v36  ;;  %1154 = vmatpush.msrb.mxu3 %v2595_v37 }
 0x3f2   :  { %1095 = vmatpush.msrb.mxu0 %v2596_v40  ;;  %1115 = vmatpush.msrb.mxu1 %v2597_v41 }
 0x3f3   :  { %1135 = vmatpush.msrb.mxu2 %v2598_v61  ;;  %1155 = vmatpush.msrb.mxu3 %v2599_v53 }
 0x44f   :  { %v849_v60 = vpop.f32.mrf.mxu1  ;;  %v829_v39 = vpop.f32.mrf.mxu0 }
 0x450   :  { %v896_v46 = vrot.slane %v849_v60, 7 }
 0x452   :  { %v899_v47 = vsel %vm226_vm0, %v829_v39, %v896_v46 }
 0x456   :  { %v869_v49 = vpop.f32.mrf.mxu2  ;;  %v889_v58 = vpop.f32.mrf.mxu3 }
 0x457   :  { %v897_v43 = vrot.slane %v869_v49, 6  ;;  %v898_v38 = vrot.slane %v889_v58, 5 }
 0x459   :  { %v900_v56 = vsel %vm228_vm1, %v897_v43, %v898_v38 }
 0x45a   :  { %v901_v63 = vsel %vm230_vm2, %v899_v47, %v900_v56 }
 0x45b   :  { %v903_v8 = vadd.f32 %v901_v63, %v811_v48 }
 0x45d   :  { %v1263_v2 = vmul.f32 -1.442695, %v903_v8 }
 0x45f   :  { %1309 = vpow2.f32 %v1263_v2 }
 0x465   :  { %v1310_v3 = vpop.eup %1309 }
 0x466   :  { %v907_v10 = vadd.f32 1.0, %v1310_v3 }
 0x468   :  { %1311 = vrcp.f32 %v907_v10  ;;  %v919_v13 = vand.u32 2147483648, %v907_v10  ;;  %v917_v16 = vand.u32 2147483647, %v907_v10  ;;  %vm913_vm3 = vweird.f32 %v907_v10 }
 0x46a   :  { %v920_v14 = vor.u32 1.1754944e-38, %v919_v13  ;;  %vm918_vm5 = vcmp.eq.f32.partialorder %v917_v16, 8.507059e+37 }
 0x46e   :  { %v1312_v17 = vpop.eup %1311 }
 0x46f   :  { %v909_v44 = vmul.f32 %v1312_v17, %v907_v10  ;;  %vm914_vm15 = vweird.f32 %v1312_v17 }
 0x470   :  { %vm915_vm4 = vmor %vm913_vm3, %vm914_vm15 }
 0x471   :  { %v910_v45 = vsub.f32 1.0, %v909_v44 }
 0x473   :  { %v911_v62 = vmul.f32 %v1312_v17, %v910_v45 }
 0x475   :  { %v912_v1 = vadd.f32 %v1312_v17, %v911_v62 }
 0x477   :  { %v916_v0 = vsel %vm915_vm4, %v1312_v17, %v912_v1  ;;  %v1077_v17 = vstv %s1268_s20  ;;  %vm1239_vm4 = vcmask 7168  }
 0x478   :  { %v921_v7 = vsel %vm918_vm5, %v920_v14, %v916_v0  ;;  %v1078_v45 = vmul.f32 %v2360_v54, %v1077_v17 }
 0x479   :  { %v924_v12 = vrot.slane %v921_v7, 2  ;;  %v928_v15 = vrot.slane %v921_v7, 1  ;;  %v934_v6 = vrot.slane %v921_v7, 3 }
 0x47a   :  { %v1079_v14 = vadd.f32 %v2363_v59, %v1078_v45 }
 0x47b   :  { %v926_v11 = vmul.f32 2.0, %v924_v12  ;;  %v930_v18 = vmul.f32 %v928_v15, %v2286_v19  ;;  %v944_v19 = vmul.f32 %v2360_v54, %v943_v22 }
 0x47d   :  { %v1264_v51 = vadd.f32 -1.0, %v926_v11  ;;  %v945_v28 = vadd.f32 %v2363_v59, %v944_v19 }
 0x47f   :  { %v931_v24 = vmul.f32 %v1264_v51, %v921_v7 }
 0x481   :  { %v932_v21 = vadd.f32 %v931_v24, %v930_v18 }
 0x483   :  { %1313 = vtanh.f32 %v932_v21 }
 0x489   :  { %v1314_v4 = vpop.eup %1313 }
 0x48a   :  { %v936_v5 = vmul.f32 %v1314_v4, %v934_v6 }
 0x48c   :  { %962 = vmatmul.f32.vlgmr.msra.gmra.mxu0 %v936_v5  ;;  %982 = vmatmul.f32.vlgmr.msra.gmra.mxu1 %v936_v5  ;;  %v939_v42 = vperm.slane %v936_v5, 0 }
 0x48d   :  { %1002 = vmatmul.f32.vlgmr.msra.gmra.mxu2 %v936_v5  ;;  %1022 = vmatmul.f32.vlgmr.msra.gmra.mxu3 %v936_v5 }
 0x48e   :  { %v941_v9 = vsel %vm937_vm6, %v939_v42, %v2293_v20 }
 0x509   :  { %v983_v23 = vpop.f32.mrf.mxu1  ;;  %v963_v30 = vpop.f32.mrf.mxu0 }
 0x50a   :  { %v1030_v25 = vrot.slane %v983_v23, 7 }
 0x50c   :  { %v1033_v31 = vsel %vm226_vm0, %v963_v30, %v1030_v25 }
 0x510   :  { %v1003_v26 = vpop.f32.mrf.mxu2  ;;  %v1023_v50 = vpop.f32.mrf.mxu3 }
 0x511   :  { %v1031_v27 = vrot.slane %v1003_v26, 6  ;;  %v1032_v29 = vrot.slane %v1023_v50, 5 }
 0x513   :  { %v1034_v32 = vsel %vm228_vm1, %v1031_v27, %v1032_v29 }
 0x514   :  { %v1035_v33 = vsel %vm230_vm2, %v1033_v31, %v1034_v32 }
 0x515   :  { %v1037_v20 = vadd.f32 %v1035_v33, %v945_v28 }
 0x517   :  { %v1266_v34 = vmul.f32 -1.442695, %v1037_v20  ;;  %v1278_v20 = vld [vmem:[%s2397_s4] ss:$0 sm:$0xff] }
 0x519   :  { %1315 = vpow2.f32 %v1266_v34 }
 0x51f   :  { %v1316_v35 = vpop.eup %1315 }
 0x520   :  { %v1041_v36 = vadd.f32 1.0, %v1316_v35 }
 0x522   :  { %1317 = vrcp.f32 %v1041_v36  ;;  %v1053_v61 = vand.u32 2147483648, %v1041_v36  ;;  %v1051_v55 = vand.u32 2147483647, %v1041_v36  ;;  %vm1047_vm8 = vweird.f32 %v1041_v36 }
 0x524   :  { %v1054_v57 = vor.u32 1.1754944e-38, %v1053_v61  ;;  %vm1052_vm10 = vcmp.eq.f32.partialorder %v1051_v55, 8.507059e+37 }
 0x528   :  { %v1318_v37 = vpop.eup %1317 }
 0x529   :  { %v1043_v40 = vmul.f32 %v1318_v37, %v1041_v36  ;;  %vm1048_vm7 = vweird.f32 %v1318_v37 }
 0x52a   :  { %vm1049_vm9 = vmor %vm1047_vm8, %vm1048_vm7 }
 0x52b   :  { %v1044_v41 = vsub.f32 1.0, %v1043_v40 }
 0x52d   :  { %v1045_v53 = vmul.f32 %v1318_v37, %v1044_v41 }
 0x52f   :  { %v1046_v60 = vadd.f32 %v1318_v37, %v1045_v53 }
 0x531   :  { %v1050_v46 = vsel %vm1049_vm9, %v1318_v37, %v1046_v60  ;;  %v1218_v37 = vstv %s2398_s5 }
 0x532   :  { %v1055_v49 = vsel %vm1052_vm10, %v1054_v57, %v1050_v46 }
 0x533   :  { %v1058_v58 = vrot.slane %v1055_v49, 2  ;;  %v1062_v48 = vrot.slane %v1055_v49, 1  ;;  %v1068_v63 = vrot.slane %v1055_v49, 3 }
 0x535   :  { %v1060_v43 = vmul.f32 2.0, %v1058_v58  ;;  %v1064_v39 = vmul.f32 %v1062_v48, %v932_v21 }
 0x537   :  { %v1267_v38 = vadd.f32 -1.0, %v1060_v43 }
 0x539   :  { %v1065_v47 = vmul.f32 %v1267_v38, %v1055_v49 }
 0x53b   :  { %v1066_v56 = vadd.f32 %v1065_v47, %v1064_v39 }
 0x53d   :  { %1319 = vtanh.f32 %v1066_v56 }
 0x543   :  { %v1320_v8 = vpop.eup %1319 }
 0x544   :  { %v1070_v2 = vmul.f32 %v1320_v8, %v1068_v63 }
 0x546   :  { %1096 = vmatmul.f32.vlgmr.msrb.gmra.mxu0 %v1070_v2  ;;  %1116 = vmatmul.f32.vlgmr.msrb.gmra.mxu1 %v1070_v2  ;;  %v1073_v3 = vperm.slane %v1070_v2, 0 }
 0x547   :  { %1136 = vmatmul.f32.vlgmr.msrb.gmra.mxu2 %v1070_v2  ;;  %1156 = vmatmul.f32.vlgmr.msrb.gmra.mxu3 %v1070_v2 }
 0x548   :  { %v1075_v10 = vsel %vm1071_vm11, %v1073_v3, %v941_v9 }
 0x5c3   :  { %v1117_v44 = vpop.f32.mrf.mxu1  ;;  %v1097_v7 = vpop.f32.mrf.mxu0 }
 0x5c4   :  { %v1164_v13 = vrot.slane %v1117_v44, 7 }
 0x5c6   :  { %v1167_v12 = vsel %vm226_vm0, %v1097_v7, %v1164_v13 }
 0x5ca   :  { %v1137_v62 = vpop.f32.mrf.mxu2  ;;  %v1157_v16 = vpop.f32.mrf.mxu3 }
 0x5cb   :  { %v1165_v1 = vrot.slane %v1137_v62, 6  ;;  %v1166_v0 = vrot.slane %v1157_v16, 5 }
 0x5cd   :  { %v1168_v11 = vsel %vm228_vm1, %v1165_v1, %v1166_v0 }
 0x5ce   :  { %v1169_v15 = vsel %vm230_vm2, %v1167_v12, %v1168_v11  ;;  %vm1205_vm2 = vcmp.eq.s32.totalorder %v1927_v52, 7 }
 0x5cf   :  { %v1171_v51 = vadd.f32 %v1169_v15, %v1079_v14 }
 0x5d1   :  { %v1269_v18 = vmul.f32 -1.442695, %v1171_v51 }
 0x5d3   :  { %1321 = vpow2.f32 %v1269_v18 }
 0x5d9   :  { %v1322_v24 = vpop.eup %1321 }
 0x5da   :  { %v1175_v21 = vadd.f32 1.0, %v1322_v24 }
 0x5dc   :  { %1323 = vrcp.f32 %v1175_v21  ;;  %v1187_v5 = vand.u32 2147483648, %v1175_v21  ;;  %v1185_v59 = vand.u32 2147483647, %v1175_v21  ;;  %vm1181_vm13 = vweird.f32 %v1175_v21 }
 0x5de   :  { %v1188_v22 = vor.u32 1.1754944e-38, %v1187_v5  ;;  %vm1186_vm1 = vcmp.eq.f32.partialorder %v1185_v59, 8.507059e+37 }
 0x5e2   :  { %v1324_v54 = vpop.eup %1323 }
 0x5e3   :  { %v1177_v6 = vmul.f32 %v1324_v54, %v1175_v21  ;;  %vm1182_vm12 = vweird.f32 %v1324_v54 }
 0x5e4   :  { %vm1183_vm0 = vmor %vm1181_vm13, %vm1182_vm12 }
 0x5e5   :  { %v1178_v4 = vsub.f32 1.0, %v1177_v6 }
 0x5e7   :  { %v1179_v42 = vmul.f32 %v1324_v54, %v1178_v4 }
 0x5e9   :  { %v1180_v9 = vadd.f32 %v1324_v54, %v1179_v42 }
 0x5eb   :  { %v1184_v23 = vsel %vm1183_vm0, %v1324_v54, %v1180_v9 }
 0x5ec   :  { %v1189_v19 = vsel %vm1186_vm1, %v1188_v22, %v1184_v23 }
 0x5ed   :  { %v1192_v25 = vrot.slane %v1189_v19, 2  ;;  %v1196_v50 = vrot.slane %v1189_v19, 1  ;;  %v1202_v31 = vrot.slane %v1189_v19, 3 }
 0x5ef   :  { %v1194_v26 = vmul.f32 2.0, %v1192_v25  ;;  %v1198_v28 = vmul.f32 %v1196_v50, %v1066_v56 }
 0x5f1   :  { %v1270_v27 = vadd.f32 -1.0, %v1194_v26 }
 0x5f3   :  { %v1199_v29 = vmul.f32 %v1270_v27, %v1189_v19 }
 0x5f5   :  { %v1200_v30 = vadd.f32 %v1199_v29, %v1198_v28 }
 0x5f7   :  { %1325 = vtanh.f32 %v1200_v30 }
 0x5fd   :  { %v1326_v32 = vpop.eup %1325 }
 0x5fe   :  { %v1204_v33 = vmul.f32 %v1326_v32, %v1202_v31 }
 0x600   :  { %v1207_v34 = vperm.slane %v1204_v33, 0 }
 0x602   :  { %v1209_v35 = vsel %vm1205_vm2, %v1207_v34, %v1075_v10 }
 0x603   :  { %v1214_v36 = vmul.f32 %v1278_v20, %v1209_v35 }
 0x605   :  { %1215 = vadd.xlane.f32.xlu0 %v1214_v36 }
 0x678   :  { %v1216_v40 = vpop.xlane.xlu0 %1215 }
 0x679   :  { %v1219_v41 = vadd.f32 %v1218_v37, %v1216_v40 }
 0x67b   :  { %v1271_v61 = vmul.f32 -1.442695, %v1219_v41 }
 0x67d   :  { %1327 = vpow2.f32 %v1271_v61 }
 0x683   :  { %v1328_v53 = vpop.eup %1327 }
 0x684   :  { %v1223_v55 = vadd.f32 1.0, %v1328_v53 }
 0x686   :  { %1329 = vrcp.f32 %v1223_v55  ;;  %v1235_v46 = vand.u32 2147483648, %v1223_v55  ;;  %v1233_v58 = vand.u32 2147483647, %v1223_v55  ;;  %vm1229_vm15 = vweird.f32 %v1223_v55 }
 0x688   :  { %v1236_v48 = vor.u32 1.1754944e-38, %v1235_v46  ;;  %vm1234_vm5 = vcmp.eq.f32.partialorder %v1233_v58, 8.507059e+37 }
 0x68c   :  { %v1330_v52 = vpop.eup %1329 }
 0x68d   :  { %v1225_v60 = vmul.f32 %v1330_v52, %v1223_v55  ;;  %vm1230_vm14 = vweird.f32 %v1330_v52 }
 0x68e   :  { %vm1231_vm3 = vmor %vm1229_vm15, %vm1230_vm14 }
 0x68f   :  { %v1226_v57 = vsub.f32 1.0, %v1225_v60 }
 0x691   :  { %v1227_v49 = vmul.f32 %v1330_v52, %v1226_v57 }
 0x693   :  { %v1228_v43 = vadd.f32 %v1330_v52, %v1227_v49 }
 0x695   :  { %v1232_v38 = vsel %vm1231_vm3, %v1330_v52, %v1228_v43 }
 0x696   :  { %v1237_v39 = vsel %vm1234_vm5, %v1236_v48, %v1232_v38 }
 0x697   :  { %1240 = vst.msk [vmem:[%s2399_s6] sm:$0xff] %vm1239_vm4, %v1237_v39 }
 0x698   :  { %1245 = vsyncpa [#allocation4], 1 }
 0x699   :  { %1246 = vsyncpa [#allocation8], 1 }
 0x69a   :  { %1247 = vsyncpa [#allocation5], 1 }

</bundles_post_ra>
